<compile_context>
chip_gen: v6e
topology: v6e:2x2x1
jax: 0.10.0
libtpu: 0.0.40
codegen_flags: <defaults>
</compile_context>

<pallas_src>
import functools

import jax
import jax.numpy as jnp
from jax.experimental import pallas as pl
from jax.experimental.pallas import tpu as pltpu


def _round_up(x, m):
    return (x + m - 1) // m * m


# --------------------------------------------------------------------------
# Kernel 1: fused SH FC layers  (x @ W1) * s1 + b1 -> relu -> (@ W2) + b2
# --------------------------------------------------------------------------
def sh_fc_kernel(x_ref, w1_ref, s1_ref, b1_ref, w2_ref, b2_ref, o_ref):
    h = jnp.dot(x_ref[...], w1_ref[...], preferred_element_type=jnp.float32)
    h = jnp.maximum(h * s1_ref[...] + b1_ref[...], 0.0)
    o = jnp.dot(h, w2_ref[...], preferred_element_type=jnp.float32) + b2_ref[...]
    o_ref[...] = o.astype(o_ref.dtype)


def sh_fc(x, w1, s1, b1, w2, b2, *, tile_m=512):
    """Fused FC+BN+ReLU+FC.  Output width is lane-padded to 128 inside the
    kernel (dense stores) and sliced back outside; M is padded to tile_m so any
    point count works."""
    M, c_in = x.shape
    hid = w1.shape[1]
    c_out = w2.shape[1]
    n_pad = _round_up(max(c_out, 128), 128)       # lane-dense output
    m_pad = _round_up(M, tile_m)

    x_p = x if m_pad == M else jnp.pad(x, ((0, m_pad - M), (0, 0)))
    w2_p = jnp.pad(w2, ((0, 0), (0, n_pad - c_out)))
    b2_p = jnp.pad(b2.reshape(1, -1), ((0, 0), (0, n_pad - c_out)))

    out = pl.pallas_call(
        sh_fc_kernel,
        out_shape=jax.ShapeDtypeStruct((m_pad, n_pad), jnp.float32),
        grid_spec=pltpu.PrefetchScalarGridSpec(
            num_scalar_prefetch=0,
            grid=(m_pad // tile_m,),
            in_specs=[
                pl.BlockSpec((tile_m, c_in), lambda i: (i, 0)),
                pl.BlockSpec((c_in, hid), lambda i: (0, 0)),
                pl.BlockSpec((1, hid), lambda i: (0, 0)),
                pl.BlockSpec((1, hid), lambda i: (0, 0)),
                pl.BlockSpec((hid, n_pad), lambda i: (0, 0)),
                pl.BlockSpec((1, n_pad), lambda i: (0, 0)),
            ],
            out_specs=pl.BlockSpec((tile_m, n_pad), lambda i: (i, 0)),
        ),
        compiler_params=pltpu.CompilerParams(
            dimension_semantics=("parallel",),
            vmem_limit_bytes=32 * 1024 * 1024,
        ),
    )(x_p, w1, s1.reshape(1, -1), b1.reshape(1, -1), w2_p, b2_p)
    return out[:M, :c_out]


# --------------------------------------------------------------------------
# Kernel 2: fused (3x3 conv + BN + ReLU) x 2 on a dense BEV grid.
#
# Dense BEV layout in HBM (bf16):  (B, (H+4)*W_pad, 128) flattened rows,
#   padded row p = y + 2  (2 zero rows above/below),
#   column        q = x   (zero columns at [W, W_pad), W_pad = roundup(W+1,16)).
# A 3x3 tap (ky,kx) of output element m = r*W_pad + c is input element
# m + ky*W_pad + (kx-1); left/right zero padding is provided by the zero pad
# columns of the neighbouring flattened row, so no per-tap unaligned W slices
# are needed on the hot path.
# --------------------------------------------------------------------------
def fused_conv_kernel(x_hbm, w1_ref, s1_ref, b1_ref, w2_ref, s2_ref, b2_ref,
                      o_ref, xbuf, dma_sem, xf32_ref, t1_ref,
                      *, th, H, W, W_pad, C):
    b = pl.program_id(0)
    i = pl.program_id(1)
    n_tiles = pl.num_programs(1)

    L = (th + 4) * W_pad     # flattened rows DMA'd per tile (2-row halo each side)
    M1 = (th + 2) * W_pad    # conv1 intermediate rows (1-row halo for conv2)
    M2 = th * W_pad          # conv2 output rows
    PAD = 16                 # head/tail slack rows kept at zero (for the +-1 tap offsets)

    def tile_copy(bb, ii, slot):
        return pltpu.make_async_copy(
            x_hbm.at[bb, pl.ds(ii * (th * W_pad), L)],
            xbuf.at[slot],
            dma_sem.at[slot],
        )

    slot = i % 2

    # Prime the pipeline at the first row tile of each batch image, then keep
    # one tile of prefetch in flight (double-buffered manual DMA).
    @pl.when(i == 0)
    def _prime():
        tile_copy(b, i, 0).start()

    tile_copy(b, i, slot).wait()

    @pl.when(i + 1 < n_tiles)
    def _prefetch():
        tile_copy(b, i + 1, 1 - slot).start()

    # One aligned pass: bf16 DMA landing buffer -> f32 working tile.
    xf32_ref[pl.ds(PAD, L), :] = xbuf[slot].astype(jnp.float32)

    # Slack rows stand in for out-of-window neighbours whose true value is
    # always a zero padding column -> keep them zero.
    zpad = jnp.zeros((PAD, C), jnp.float32)
    xf32_ref[pl.ds(0, PAD), :] = zpad
    xf32_ref[pl.ds(PAD + L, PAD), :] = zpad
    t1_ref[pl.ds(0, PAD), :] = zpad
    t1_ref[pl.ds(PAD + M1, PAD), :] = zpad

    def conv3x3(src_ref, rows, w_ref, s_ref, b_ref):
        # im2col along the contraction dim: 9 taps -> K = 9*C, a single MXU
        # matmul (bf16 operands, f32 accumulate) instead of 9 K=128 matmuls.
        taps = []
        for ky in range(3):
            for kx in range(3):
                off = PAD + ky * W_pad + (kx - 1)
                taps.append(src_ref[pl.ds(off, rows), :].astype(jnp.bfloat16))
        a = jnp.concatenate(taps, axis=-1)                            # (rows, 9C)
        acc = jnp.dot(a, w_ref[...], preferred_element_type=jnp.float32)
        return jnp.maximum(acc * s_ref[...] + b_ref[...], 0.0)        # BN/bias + ReLU

    # ---- conv_out ----
    t1 = conv3x3(xf32_ref, M1, w1_ref, s1_ref, b1_ref)                # (M1, C) f32

    # Zero conv1's output outside the valid (H, W) region so the second conv
    # sees proper zero padding at tile borders and in the pad columns.
    flat = jax.lax.broadcasted_iota(jnp.int32, (M1, 1), 0)
    col = flat % W_pad
    y = i * th - 1 + flat // W_pad
    valid = (col < W) & (y >= 0) & (y < H)
    t1_ref[pl.ds(PAD, M1), :] = jnp.where(valid, t1, 0.0)

    # ---- shared_conv (intermediate never leaves VMEM) ----
    out = conv3x3(t1_ref, M2, w2_ref, s2_ref, b2_ref)                 # (M2, C) f32
    o_ref[0] = out.reshape(th, W_pad, C)[:, :W, :].astype(o_ref.dtype)


def fused_conv3x3_pair(x_flat, w1, s1, b1, w2, s2, b2, *, H, W, W_pad, th):
    """x_flat: (B, (H+4)*W_pad, C) bf16 padded dense BEV.  Returns (B,H,W,C) f32."""
    B, rows, C = x_flat.shape
    assert rows == (H + 4) * W_pad and H % th == 0 and W_pad % 16 == 0
    n_tiles = H // th
    L = (th + 4) * W_pad
    M1 = (th + 2) * W_pad
    kern = functools.partial(fused_conv_kernel, th=th, H=H, W=W, W_pad=W_pad, C=C)
    return pl.pallas_call(
        kern,
        out_shape=jax.ShapeDtypeStruct((B, H, W, C), jnp.float32),
        grid_spec=pltpu.PrefetchScalarGridSpec(
            num_scalar_prefetch=0,
            grid=(B, n_tiles),
            in_specs=[
                pl.BlockSpec(memory_space=pl.ANY),                  # dense BEV stays in HBM
                pl.BlockSpec((9 * C, C), lambda b, i: (0, 0)),      # conv1 taps stacked on K
                pl.BlockSpec((1, C), lambda b, i: (0, 0)),
                pl.BlockSpec((1, C), lambda b, i: (0, 0)),
                pl.BlockSpec((9 * C, C), lambda b, i: (0, 0)),      # conv2 taps stacked on K
                pl.BlockSpec((1, C), lambda b, i: (0, 0)),
                pl.BlockSpec((1, C), lambda b, i: (0, 0)),
            ],
            out_specs=pl.BlockSpec((1, th, W, C), lambda b, i: (b, i, 0, 0)),
            scratch_shapes=[
                pltpu.VMEM((2, L, C), jnp.bfloat16),                # double-buffered DMA landing
                pltpu.SemaphoreType.DMA((2,)),
                pltpu.VMEM((L + 32, C), jnp.float32),               # f32 working tile (+slack)
                pltpu.VMEM((M1 + 32, C), jnp.float32),              # conv1->conv2 intermediate
            ],
        ),
        compiler_params=pltpu.CompilerParams(
            dimension_semantics=("parallel", "arbitrary"),          # B shards across cores
            vmem_limit_bytes=48 * 1024 * 1024,                      # fits v7x's 64 MiB VMEM
        ),
    )(x_flat, w1, s1.reshape(1, -1), b1.reshape(1, -1),
      w2, s2.reshape(1, -1), b2.reshape(1, -1))


# --------------------------------------------------------------------------
# BN folding + forward (mirrors PointExpandVoxel.forward)
# --------------------------------------------------------------------------
def fold_bn(gamma, beta, mean, var, bias=None, eps=1e-3):
    scale = gamma / jnp.sqrt(var + eps)
    shift = beta - scale * mean
    if bias is not None:
        shift = shift + scale * bias
    return scale, shift


def point_expand_voxel_forward(encoder_features, coords_b, coords_y, coords_x,
                               params, grid_hw):
    B, c_in, N = encoder_features.shape
    H, W = grid_hw
    C = params["wc1"].shape[-1]
    # permute(0, 2, 1).view(-1, C)
    ins_features = jnp.transpose(encoder_features, (0, 2, 1)).reshape(-1, c_in)

    # sh_layers (Pallas kernel 1)
    pred_sh = sh_fc(ins_features, params["w1"], params["s1"], params["b1"],
                    params["w2"], params["b2"])

    # TODO(synk): al_utils.get_sparse_voxel_feature is external; approximate by
    # scattering the first 128 point channels directly into the *padded* dense
    # BEV layout (no jnp.pad copy; duplicate coords are last-write-wins).
    W_pad = _round_up(W + 1, 16)
    feats = ins_features[:, :C].astype(jnp.bfloat16)
    flat_idx = (coords_y + 2) * W_pad + coords_x
    dense_flat = jnp.zeros((B, (H + 4) * W_pad, C), jnp.bfloat16)
    dense_flat = dense_flat.at[coords_b, flat_idx].set(feats)

    # conv_out + shared_conv fused (Pallas kernel 2), bf16 weights.
    wc1 = params["wc1"].astype(jnp.bfloat16).reshape(9 * C, C)
    wc2 = params["wc2"].astype(jnp.bfloat16).reshape(9 * C, C)
    th = next(t for t in (32, 25, 20, 16, 10, 8, 5, 4, 2, 1) if H % t == 0)
    bev = fused_conv3x3_pair(dense_flat, wc1, params["sc1"], params["bc1"],
                             wc2, params["sc2"], params["bc2"],
                             H=H, W=W, W_pad=W_pad, th=th)
    return pred_sh, bev, dense_flat


# --------------------------------------------------------------------------
# Pure-JAX references (for correctness check)
# --------------------------------------------------------------------------
def ref_sh_fc(x, w1, s1, b1, w2, b2):
    h = jnp.maximum(x @ w1 * s1 + b1, 0.0)
    return h @ w2 + b2


def ref_conv_pair(dense, w1_9, s1, b1, w2_9, s2, b2):
    def conv(x, w9, s, b):
        w = w9.reshape(3, 3, w9.shape[1], w9.shape[2])     # HWIO
        y = jax.lax.conv_general_dilated(
            x, w, window_strides=(1, 1), padding="SAME",
            dimension_numbers=("NHWC", "HWIO", "NHWC"))
        return jnp.maximum(y * s + b, 0.0)
    t1 = conv(dense, w1_9, s1, b1)
    t1 = t1.astype(jnp.bfloat16).astype(jnp.float32)       # kernel feeds conv2 with bf16
    return conv(t1, w2_9, s2, b2)


if __name__ == "__main__":
    key = jax.random.PRNGKey(0)
    ks = jax.random.split(key, 16)

    # Small, consistent shapes.
    B, N = 2, 128            # batch, points per batch  -> 256 points total
    C_IN = 256               # fixed by the module
    SH_HID = 128             # model_cfg.SH_FC = [128]
    MAX_SH = 3               # -> (MAX_SH+1)^2 = 16 SH coefficients
    SH_OUT = (MAX_SH + 1) ** 2
    C_BEV = 128              # SHARED_CONV_CHANNEL
    H, W = 16, 16            # scaled-down BEV grid (real module uses [200, 176])

    encoder_features = jax.random.normal(ks[0], (B, C_IN, N), jnp.float32) * 0.5

    coords_b = jnp.repeat(jnp.arange(B, dtype=jnp.int32), N)
    coords_y = jax.random.randint(ks[1], (B * N,), 0, H, jnp.int32)
    coords_x = jax.random.randint(ks[2], (B * N,), 0, W, jnp.int32)

    # sh_layers params (Linear no-bias + BN folded, then Linear with bias)
    w1 = jax.random.normal(ks[3], (C_IN, SH_HID), jnp.float32) * 0.05
    g1 = 1.0 + 0.1 * jax.random.normal(ks[4], (SH_HID,), jnp.float32)
    be1 = 0.1 * jax.random.normal(ks[5], (SH_HID,), jnp.float32)
    mu1 = 0.1 * jax.random.normal(ks[6], (SH_HID,), jnp.float32)
    va1 = 1.0 + 0.1 * jax.random.uniform(ks[7], (SH_HID,), jnp.float32)
    s1, b1 = fold_bn(g1, be1, mu1, va1)
    w2 = jax.random.normal(ks[8], (SH_HID, SH_OUT), jnp.float32) * 0.05
    b2 = 0.1 * jax.random.normal(ks[9], (SH_OUT,), jnp.float32)

    # conv_out (no conv bias) and shared_conv (with conv bias), BN folded.
    wc1 = jax.random.normal(ks[10], (9, C_BEV, C_BEV), jnp.float32) * 0.02
    sc1, bc1 = fold_bn(jnp.ones((C_BEV,)), jnp.zeros((C_BEV,)),
                       0.05 * jnp.ones((C_BEV,)), jnp.ones((C_BEV,)))
    wc2 = jax.random.normal(ks[11], (9, C_BEV, C_BEV), jnp.float32) * 0.02
    conv2_bias = 0.1 * jax.random.normal(ks[12], (C_BEV,), jnp.float32)
    sc2, bc2 = fold_bn(jnp.ones((C_BEV,)), jnp.zeros((C_BEV,)),
                       jnp.zeros((C_BEV,)), jnp.ones((C_BEV,)), bias=conv2_bias)

    params = dict(w1=w1, s1=s1, b1=b1, w2=w2, b2=b2,
                  wc1=wc1, sc1=sc1, bc1=bc1, wc2=wc2, sc2=sc2, bc2=bc2)

    pred_sh, bev_out, dense_flat = point_expand_voxel_forward(
        encoder_features, coords_b, coords_y, coords_x, params, (H, W))
    jax.block_until_ready((pred_sh, bev_out))

    # Correctness check against pure-JAX references (conv path uses the same
    # bf16-rounded weights/activations the kernel uses).
    ins = jnp.transpose(encoder_features, (0, 2, 1)).reshape(-1, C_IN)
    ref_sh = ref_sh_fc(ins, w1, s1, b1, w2, b2)

    W_PAD = _round_up(W + 1, 16)
    dense_ref = dense_flat.reshape(B, H + 4, W_PAD, C_BEV)[:, 2:2 + H, :W, :]
    dense_ref = dense_ref.astype(jnp.float32)
    wc1_r = wc1.astype(jnp.bfloat16).astype(jnp.float32)
    wc2_r = wc2.astype(jnp.bfloat16).astype(jnp.float32)
    ref_bev = ref_conv_pair(dense_ref, wc1_r, sc1, bc1, wc2_r, sc2, bc2)

    assert jnp.allclose(pred_sh, ref_sh, atol=1e-2, rtol=1e-2), \
        float(jnp.max(jnp.abs(pred_sh - ref_sh)))
    assert jnp.allclose(bev_out, ref_bev, atol=2e-2, rtol=2e-2), \
        float(jnp.max(jnp.abs(bev_out - ref_bev)))

    print("KERNEL_OK")
</pallas_src>

<mosaic_0001>
module attributes {stable_mosaic.version = 11 : i64} {
  func.func @sh_fc_kernel(%arg0: i32, %arg1: memref<512x256xf32, #tpu.memory_space<vmem>>, %arg2: memref<256x128xf32, #tpu.memory_space<vmem>>, %arg3: memref<1x128xf32, #tpu.memory_space<vmem>>, %arg4: memref<1x128xf32, #tpu.memory_space<vmem>>, %arg5: memref<128x128xf32, #tpu.memory_space<vmem>>, %arg6: memref<1x128xf32, #tpu.memory_space<vmem>>, %arg7: memref<512x128xf32, #tpu.memory_space<vmem>>) attributes {dimension_semantics = [#tpu.dimension_semantics<parallel>], iteration_bounds = array<i64: 1>, scalar_prefetch = 0 : i64, scratch_operands = 0 : i64, tpu.core_type = #tpu.core_type<tc>, window_params = [{transform_indices = @transform_0, window_bounds = array<i64: 512, 256>}, {pipeline_mode = #tpu.pipeline_mode<synchronous>, transform_indices = @transform_1, window_bounds = array<i64: 256, 128>}, {pipeline_mode = #tpu.pipeline_mode<synchronous>, transform_indices = @transform_2, window_bounds = array<i64: 1, 128>}, {pipeline_mode = #tpu.pipeline_mode<synchronous>, transform_indices = @transform_3, window_bounds = array<i64: 1, 128>}, {pipeline_mode = #tpu.pipeline_mode<synchronous>, transform_indices = @transform_4, window_bounds = array<i64: 128, 128>}, {pipeline_mode = #tpu.pipeline_mode<synchronous>, transform_indices = @transform_5, window_bounds = array<i64: 1, 128>}, {transform_indices = @transform_6, window_bounds = array<i64: 512, 128>}]} {
    %c0 = arith.constant 0 : index
    %c0_0 = arith.constant 0 : index
    %0 = vector.load %arg1[%c0, %c0_0] : memref<512x256xf32, #tpu.memory_space<vmem>>, vector<512x256xf32>
    %c0_1 = arith.constant 0 : index
    %c0_2 = arith.constant 0 : index
    %1 = vector.load %arg2[%c0_1, %c0_2] : memref<256x128xf32, #tpu.memory_space<vmem>>, vector<256x128xf32>
    %cst = arith.constant dense<0.000000e+00> : vector<512x128xf32>
    %2 = tpu.matmul %0, %1, %cst {dimension_numbers = #tpu.dot_dimension_numbers<[1], [0], [0], [1], [0, 0, 1, 1], [], []>} : vector<512x256xf32>, vector<256x128xf32>, vector<512x128xf32> -> vector<512x128xf32>
    %c0_3 = arith.constant 0 : index
    %c0_4 = arith.constant 0 : index
    %3 = vector.load %arg3[%c0_3, %c0_4] : memref<1x128xf32, #tpu.memory_space<vmem>>, vector<1x128xf32>
    %4 = vector.broadcast %3 : vector<1x128xf32> to vector<512x128xf32>
    %5 = arith.mulf %2, %4 : vector<512x128xf32>
    %c0_5 = arith.constant 0 : index
    %c0_6 = arith.constant 0 : index
    %6 = vector.load %arg4[%c0_5, %c0_6] : memref<1x128xf32, #tpu.memory_space<vmem>>, vector<1x128xf32>
    %7 = vector.broadcast %6 : vector<1x128xf32> to vector<512x128xf32>
    %8 = arith.addf %5, %7 : vector<512x128xf32>
    %cst_7 = arith.constant 0.000000e+00 : f32
    %9 = vector.broadcast %cst_7 : f32 to vector<512x128xf32>
    %10 = arith.maximumf %8, %9 : vector<512x128xf32>
    %c0_8 = arith.constant 0 : index
    %c0_9 = arith.constant 0 : index
    %11 = vector.load %arg5[%c0_8, %c0_9] : memref<128x128xf32, #tpu.memory_space<vmem>>, vector<128x128xf32>
    %cst_10 = arith.constant dense<0.000000e+00> : vector<512x128xf32>
    %12 = tpu.matmul %10, %11, %cst_10 {dimension_numbers = #tpu.dot_dimension_numbers<[1], [0], [0], [1], [0, 0, 1, 1], [], []>} : vector<512x128xf32>, vector<128x128xf32>, vector<512x128xf32> -> vector<512x128xf32>
    %c0_11 = arith.constant 0 : index
    %c0_12 = arith.constant 0 : index
    %13 = vector.load %arg6[%c0_11, %c0_12] : memref<1x128xf32, #tpu.memory_space<vmem>>, vector<1x128xf32>
    %14 = vector.broadcast %13 : vector<1x128xf32> to vector<512x128xf32>
    %15 = arith.addf %12, %14 : vector<512x128xf32>
    %c0_13 = arith.constant 0 : index
    %c0_14 = arith.constant 0 : index
    %16 = vector.load %arg7[%c0_13, %c0_14] : memref<512x128xf32, #tpu.memory_space<vmem>>, vector<512x128xf32>
    tpu.vector_store %arg7[%c0_13, %c0_14], %15 {strides = array<i32>} : memref<512x128xf32, #tpu.memory_space<vmem>>, vector<512x128xf32>,
    return
  }
  func.func @transform_0(%arg0: i32) -> (i32, i32) {
    %c0_i32 = arith.constant 0 : i32
    %c0_i32_0 = arith.constant 0 : i32
    return %arg0, %c0_i32 : i32, i32
  }
  func.func @transform_1(%arg0: i32) -> (i32, i32) {
    %c0_i32 = arith.constant 0 : i32
    %c0_i32_0 = arith.constant 0 : i32
    %c0_i32_1 = arith.constant 0 : i32
    return %c0_i32, %c0_i32_0 : i32, i32
  }
  func.func @transform_2(%arg0: i32) -> (i32, i32) {
    %c0_i32 = arith.constant 0 : i32
    %c0_i32_0 = arith.constant 0 : i32
    %c0_i32_1 = arith.constant 0 : i32
    return %c0_i32, %c0_i32_0 : i32, i32
  }
  func.func @transform_3(%arg0: i32) -> (i32, i32) {
    %c0_i32 = arith.constant 0 : i32
    %c0_i32_0 = arith.constant 0 : i32
    %c0_i32_1 = arith.constant 0 : i32
    return %c0_i32, %c0_i32_0 : i32, i32
  }
  func.func @transform_4(%arg0: i32) -> (i32, i32) {
    %c0_i32 = arith.constant 0 : i32
    %c0_i32_0 = arith.constant 0 : i32
    %c0_i32_1 = arith.constant 0 : i32
    return %c0_i32, %c0_i32_0 : i32, i32
  }
  func.func @transform_5(%arg0: i32) -> (i32, i32) {
    %c0_i32 = arith.constant 0 : i32
    %c0_i32_0 = arith.constant 0 : i32
    %c0_i32_1 = arith.constant 0 : i32
    return %c0_i32, %c0_i32_0 : i32, i32
  }
  func.func @transform_6(%arg0: i32) -> (i32, i32) {
    %c0_i32 = arith.constant 0 : i32
    %c0_i32_0 = arith.constant 0 : i32
    return %arg0, %c0_i32 : i32, i32
  }
}

</mosaic_0001>

<bundles_post_ra>
// kernel: tpu_custom_call.1
= control target key start
LH: loop header
LB: loop body
LE: loop exit
PB: predicated region body
PF: predicated region fallthrough
CT: control target
= control target key end

     0   :  { %11 = vsyncpa [#allocation3], 0  ;;  %s2060_s0 = inlined_call_operand.hbm [shape: f32[512,256], index: 0, kind: input, shape index: {}]   ;;  %s2061_s1 = inlined_call_operand.hbm [shape: f32[256,128], index: 1, kind: input, shape index: {}]   ;;  %s2062_s2 = inlined_call_operand.vmem [shape: f32[1,128], index: 2, kind: input, shape index: {}]   ;;  %s2063_s3 = inlined_call_operand.vmem [shape: f32[1,128], index: 3, kind: input, shape index: {}]   ;;  %s2064_s4 = inlined_call_operand.hbm [shape: f32[128,128], index: 4, kind: input, shape index: {}]   ;;  %s2065_s5 = inlined_call_operand.vmem [shape: f32[1,128], index: 5, kind: input, shape index: {}]   ;;  %s2066_s6 = inlined_call_operand.hbm [shape: f32[512,128], index: 6, kind: output, shape index: {}]  }
   0x1   :  { %12 = vsyncpa [#allocation6], 0 }
   0x2   :  { %13 = vsyncpa [#allocation4], 0  ;;  %s1676_s21 = smov [#allocation5]  }
   0x3   :  { %s31_s22 = sshll.u32 %s1676_s21, 4  ;;  %s32_s22 = int_to_ptr.vmem [resolvable:$true] %s31_s22 }
   0x4   :  { %s1598_s23 = scalar_lea.vmem %s32_s22, 4096  ;;  %p1603_p1 = scmp.lt.s32.totalorder %s32_s22, %s32_s22 }
   0x5   :  { %p1599_p0 = scmp.ne.s32.totalorder %s32_s22, %s1598_s23  ;;  %p1604_p2 = scmp.lt.s32.totalorder %s1598_s23, %s1598_s23 }
   0x7   :  { %p1605_p3 = por %p1604_p2, %p1603_p1 }
   0x9   :  { %p1606_p4 = pnand %p1605_p3, %p1599_p0 }
   0xb   :  { %1609 = shalt.err (!%p1606_p4)
}
   0xc   :  { %s1677_s24 = smov 128   ;;  %s1678_s25 = smov 8  }
   0xd   :  { %37 = dma.hbm_to_vmem [thread:$0]  %s2061_s1, 4096, %s32_s22, [#allocation6], %s1677_s24, %s1677_s24, %s1678_s25  }
   0xe   :  { %s1679_s28 = smov [#allocation2]  }
   0xf   :  { %s19_s29 = sshll.u32 %s1679_s28, 4  ;;  %s20_s29 = int_to_ptr.vmem [resolvable:$true] %s19_s29 }
  0x10   :  { %s1618_s30 = scalar_lea.vmem %s20_s29, 16384  ;;  %p1623_p6 = scmp.lt.s32.totalorder %s20_s29, %s20_s29 }
  0x11   :  { %p1619_p5 = scmp.ne.s32.totalorder %s20_s29, %s1618_s30  ;;  %p1624_p7 = scmp.lt.s32.totalorder %s1618_s30, %s1618_s30 }
  0x13   :  { %p1625_p8 = por %p1624_p7, %p1623_p6 }
  0x15   :  { %p1626_p9 = pnand %p1625_p8, %p1619_p5 }
  0x17   :  { %1629 = shalt.err (!%p1626_p9)
}
  0x18   :  { %s1680_s7 = smov 256   ;;  %s1681_s8 = smov 16  }
  0x19   :  { %25 = dma.hbm_to_vmem [thread:$0]  %s2060_s0, 16384, %s20_s29, [#allocation3], %s1680_s7, %s1680_s7, %s1681_s8  }
  0x1a   :  { %s1682_s11 = smov [#allocation7]  }
  0x1b   :  { %s47_s12 = sshll.u32 %s1682_s11, 4  ;;  %s48_s12 = int_to_ptr.vmem [resolvable:$true] %s47_s12 }
  0x1c   :  { %s1638_s1 = scalar_lea.vmem %s48_s12, 2048  ;;  %p1643_p11 = scmp.lt.s32.totalorder %s48_s12, %s48_s12 }
  0x1d   :  { %p1639_p10 = scmp.ne.s32.totalorder %s48_s12, %s1638_s1  ;;  %p1644_p12 = scmp.lt.s32.totalorder %s1638_s1, %s1638_s1 }
  0x1f   :  { %p1645_p13 = por %p1644_p12, %p1643_p11 }
  0x21   :  { %p1646_p0 = pnand %p1645_p13, %p1639_p10 }
  0x23   :  { %1649 = shalt.err (!%p1646_p0)
}
  0x24   :  { %53 = dma.hbm_to_vmem [thread:$0]  %s2064_s4, 2048, %s48_s12, [#allocation6], %s1677_s24, %s1677_s24, %s1678_s25  }
  0x25   :  { %1670 = dma.done.wait [#allocation3], 16384  }
  0x26   :  { %1671 = vsyncadd [#allocation3], 4294950912 }
  0x27   :  { %1672 = dma.done.wait [#allocation6], 6144  }
  0x28   :  { %1673 = vsyncadd [#allocation6], 4294961152  ;;  %v1683_v0 = vmov 0.0   ;;  %v208_v1 = vld [vmem:[#allocation5 + $0x78] sm:$0xff]  ;;  %v207_v2 = vld [vmem:[#allocation5 + $0x70] sm:$0xff] }
  0x29   :  { %225 = vmatprep.subr.mxu0 %v1683_v0  ;;  %1517 = vmatprep.subr.mxu1 %v1683_v0  ;;  %v206_v3 = vld [vmem:[#allocation5 + $0x68] sm:$0xff]  ;;  %v205_v4 = vld [vmem:[#allocation5 + $0x60] sm:$0xff]  ;;  %v204_v5 = vld [vmem:[#allocation5 + $0x58] sm:$0xff] }
  0x2a   :  { %226 = vmatpush1.msra.mxu0 %v208_v1  ;;  %1549 = vmatpush1.msra.mxu1 %v208_v1  ;;  %v203_v6 = vld [vmem:[#allocation5 + $0x50] sm:$0xff]  ;;  %v202_v7 = vld [vmem:[#allocation5 + $0x48] sm:$0xff]  ;;  %v201_v9 = vld [vmem:[#allocation5 + $0x40] sm:$0xff] }
  0x2b   :  { %227 = vmatprep.subr.mxu0 %v1683_v0  ;;  %1518 = vmatprep.subr.mxu1 %v1683_v0  ;;  %v66_v8 = vld [vmem:[#allocation2 + $0x8] sm:$0xff]  ;;  %v200_v10 = vld [vmem:[#allocation5 + $0x38] sm:$0xff]  ;;  %v199_v11 = vld [vmem:[#allocation5 + $0x30] sm:$0xff] }
  0x2c   :  { %228 = vmatpush1.msra.mxu0 %v207_v2  ;;  %1550 = vmatpush1.msra.mxu1 %v207_v2  ;;  %v198_v12 = vld [vmem:[#allocation5 + $0x28] sm:$0xff]  ;;  %v197_v13 = vld [vmem:[#allocation5 + $0x20] sm:$0xff]  ;;  %v196_v14 = vld [vmem:[#allocation5 + $0x18] sm:$0xff] }
  0x2d   :  { %229 = vmatprep.subr.mxu0 %v1683_v0  ;;  %1519 = vmatprep.subr.mxu1 %v1683_v0  ;;  %v195_v15 = vld [vmem:[#allocation5 + $0x10] sm:$0xff]  ;;  %v194_v16 = vld [vmem:[#allocation5 + $0x8] sm:$0xff]  ;;  %v193_v17 = vld [vmem:[#allocation5] sm:$0xff] }
  0x2e   :  { %230 = vmatpush1.msra.mxu0 %v206_v3  ;;  %1551 = vmatpush1.msra.mxu1 %v206_v3  ;;  %v224_v18 = vld [vmem:[#allocation5 + $0xf8] sm:$0xff]  ;;  %v223_v19 = vld [vmem:[#allocation5 + $0xf0] sm:$0xff]  ;;  %v222_v20 = vld [vmem:[#allocation5 + $0xe8] sm:$0xff] }
  0x2f   :  { %231 = vmatprep.subr.mxu0 %v1683_v0  ;;  %1520 = vmatprep.subr.mxu1 %v1683_v0  ;;  %v221_v21 = vld [vmem:[#allocation5 + $0xe0] sm:$0xff]  ;;  %v220_v22 = vld [vmem:[#allocation5 + $0xd8] sm:$0xff]  ;;  %v219_v23 = vld [vmem:[#allocation5 + $0xd0] sm:$0xff] }
  0x30   :  { %232 = vmatpush1.msra.mxu0 %v205_v4  ;;  %1552 = vmatpush1.msra.mxu1 %v205_v4  ;;  %v218_v24 = vld [vmem:[#allocation5 + $0xc8] sm:$0xff]  ;;  %v217_v25 = vld [vmem:[#allocation5 + $0xc0] sm:$0xff]  ;;  %v216_v26 = vld [vmem:[#allocation5 + $0xb8] sm:$0xff] }
  0x31   :  { %233 = vmatprep.subr.mxu0 %v1683_v0  ;;  %1521 = vmatprep.subr.mxu1 %v1683_v0  ;;  %v215_v27 = vld [vmem:[#allocation5 + $0xb0] sm:$0xff]  ;;  %v214_v28 = vld [vmem:[#allocation5 + $0xa8] sm:$0xff]  ;;  %v213_v29 = vld [vmem:[#allocation5 + $0xa0] sm:$0xff] }
  0x32   :  { %234 = vmatpush1.msra.mxu0 %v204_v5  ;;  %1553 = vmatpush1.msra.mxu1 %v204_v5  ;;  %v212_v30 = vld [vmem:[#allocation5 + $0x98] sm:$0xff]  ;;  %v211_v31 = vld [vmem:[#allocation5 + $0x90] sm:$0xff]  ;;  %v210_v32 = vld [vmem:[#allocation5 + $0x88] sm:$0xff] }
  0x33   :  { %235 = vmatprep.subr.mxu0 %v1683_v0  ;;  %1522 = vmatprep.subr.mxu1 %v1683_v0  ;;  %v209_v33 = vld [vmem:[#allocation5 + $0x80] sm:$0xff]  ;;  %v68_v35 = vld [vmem:[#allocation2 + $0x18] sm:$0xff]  ;;  %v67_v36 = vld [vmem:[#allocation2 + $0x10] sm:$0xff] }
  0x34   :  { %236 = vmatpush1.msra.mxu0 %v203_v6  ;;  %289 = vmatprep.mubr.f32.mxu0 %v66_v8  ;;  %v65_v34 = vld [vmem:[#allocation2] sm:$0xff]  ;;  %v70_v37 = vld [vmem:[#allocation2 + $0x28] sm:$0xff]  ;;  %v72_v39 = vld [vmem:[#allocation2 + $0x38] sm:$0xff] }
  0x35   :  { %237 = vmatprep.subr.mxu0 %v1683_v0  ;;  %1554 = vmatpush1.msra.mxu1 %v203_v6  ;;  %v69_v38 = vld [vmem:[#allocation2 + $0x20] sm:$0xff]  ;;  %v162_v40 = vld [vmem:[#allocation2 + $0x308] sm:$0xff]  ;;  %v71_v42 = vld [vmem:[#allocation2 + $0x30] sm:$0xff] }
  0x36   :  { %238 = vmatpush1.msra.mxu0 %v202_v7  ;;  %1523 = vmatprep.subr.mxu1 %v1683_v0  ;;  %v161_v41 = vld [vmem:[#allocation2 + $0x300] sm:$0xff]  ;;  %v74_v43 = vld [vmem:[#allocation2 + $0x48] sm:$0xff]  ;;  %v164_v44 = vld [vmem:[#allocation2 + $0x318] sm:$0xff] }
  0x37   :  { %239 = vmatprep.subr.mxu0 %v1683_v0  ;;  %1555 = vmatpush1.msra.mxu1 %v202_v7  ;;  %v163_v45 = vld [vmem:[#allocation2 + $0x310] sm:$0xff]  ;;  %v73_v46 = vld [vmem:[#allocation2 + $0x40] sm:$0xff]  ;;  %v76_v47 = vld [vmem:[#allocation2 + $0x58] sm:$0xff] }
  0x38   :  { %240 = vmatpush1.msra.mxu0 %v201_v9  ;;  %1524 = vmatprep.subr.mxu1 %v1683_v0  ;;  %v166_v48 = vld [vmem:[#allocation2 + $0x328] sm:$0xff]  ;;  %v165_v49 = vld [vmem:[#allocation2 + $0x320] sm:$0xff]  ;;  %v75_v50 = vld [vmem:[#allocation2 + $0x50] sm:$0xff] }
  0x39   :  { %241 = vmatprep.subr.mxu0 %v1683_v0  ;;  %1556 = vmatpush1.msra.mxu1 %v201_v9  ;;  %v78_v51 = vld [vmem:[#allocation2 + $0x68] sm:$0xff]  ;;  %v168_v52 = vld [vmem:[#allocation2 + $0x338] sm:$0xff]  ;;  %v167_v53 = vld [vmem:[#allocation2 + $0x330] sm:$0xff] }
  0x3a   :  { %242 = vmatpush1.msra.mxu0 %v200_v10  ;;  %1525 = vmatprep.subr.mxu1 %v1683_v0  ;;  %v77_v54 = vld [vmem:[#allocation2 + $0x60] sm:$0xff]  ;;  %v80_v55 = vld [vmem:[#allocation2 + $0x78] sm:$0xff]  ;;  %v170_v56 = vld [vmem:[#allocation2 + $0x348] sm:$0xff] }
  0x3b   :  { %243 = vmatprep.subr.mxu0 %v1683_v0  ;;  %1557 = vmatpush1.msra.mxu1 %v200_v10  ;;  %v169_v57 = vld [vmem:[#allocation2 + $0x340] sm:$0xff]  ;;  %v79_v58 = vld [vmem:[#allocation2 + $0x70] sm:$0xff]  ;;  %v82_v59 = vld [vmem:[#allocation2 + $0x88] sm:$0xff] }
  0x3c   :  { %244 = vmatpush1.msra.mxu0 %v199_v11  ;;  %1526 = vmatprep.subr.mxu1 %v1683_v0  ;;  %v172_v60 = vld [vmem:[#allocation2 + $0x358] sm:$0xff]  ;;  %v171_v61 = vld [vmem:[#allocation2 + $0x350] sm:$0xff]  ;;  %v81_v62 = vld [vmem:[#allocation2 + $0x80] sm:$0xff] }
  0x3d   :  { %245 = vmatprep.subr.mxu0 %v1683_v0  ;;  %1558 = vmatpush1.msra.mxu1 %v199_v11  ;;  %v84_v63 = vld [vmem:[#allocation2 + $0x98] sm:$0xff]  ;;  %v173_v1 = vld [vmem:[#allocation2 + $0x360] sm:$0xff]  ;;  %v83_v2 = vld [vmem:[#allocation2 + $0x90] sm:$0xff] }
  0x3e   :  { %246 = vmatpush1.msra.mxu0 %v198_v12  ;;  %1527 = vmatprep.subr.mxu1 %v1683_v0  ;;  %v86_v3 = vld [vmem:[#allocation2 + $0xa8] sm:$0xff]  ;;  %v176_v4 = vld [vmem:[#allocation2 + $0x378] sm:$0xff]  ;;  %v175_v5 = vld [vmem:[#allocation2 + $0x370] sm:$0xff] }
  0x3f   :  { %247 = vmatprep.subr.mxu0 %v1683_v0  ;;  %1559 = vmatpush1.msra.mxu1 %v198_v12  ;;  %v85_v6 = vld [vmem:[#allocation2 + $0xa0] sm:$0xff]  ;;  %v88_v7 = vld [vmem:[#allocation2 + $0xb8] sm:$0xff]  ;;  %v178_v8 = vld [vmem:[#allocation2 + $0x388] sm:$0xff] }
  0x40   :  { %248 = vmatpush1.msra.mxu0 %v197_v13  ;;  %1528 = vmatprep.subr.mxu1 %v1683_v0  ;;  %v177_v9 = vld [vmem:[#allocation2 + $0x380] sm:$0xff]  ;;  %v87_v10 = vld [vmem:[#allocation2 + $0xb0] sm:$0xff]  ;;  %v831_v11 = vld [vmem:[#allocation7 + $0x78] sm:$0xff] }
  0x41   :  { %249 = vmatprep.subr.mxu0 %v1683_v0  ;;  %1560 = vmatpush1.msra.mxu1 %v197_v13  ;;  %v90_v12 = vld [vmem:[#allocation2 + $0xc8] sm:$0xff]  ;;  %v180_v13 = vld [vmem:[#allocation2 + $0x398] sm:$0xff] }
  0x42   :  { %250 = vmatpush1.msra.mxu0 %v196_v14  ;;  %1529 = vmatprep.subr.mxu1 %v1683_v0 }
  0x43   :  { %251 = vmatprep.subr.mxu0 %v1683_v0  ;;  %1561 = vmatpush1.msra.mxu1 %v196_v14  ;;  %v830_v14 = vld [vmem:[#allocation7 + $0x70] sm:$0xff] }
  0x44   :  { %252 = vmatpush1.msra.mxu0 %v195_v15  ;;  %1530 = vmatprep.subr.mxu1 %v1683_v0 }
  0x45   :  { %253 = vmatprep.subr.mxu0 %v1683_v0  ;;  %1562 = vmatpush1.msra.mxu1 %v195_v15  ;;  %v179_v15 = vld [vmem:[#allocation2 + $0x390] sm:$0xff] }
  0x46   :  { %254 = vmatpush1.msra.mxu0 %v194_v16  ;;  %1531 = vmatprep.subr.mxu1 %v1683_v0 }
  0x47   :  { %255 = vmatprep.subr.mxu0 %v1683_v0  ;;  %1563 = vmatpush1.msra.mxu1 %v194_v16  ;;  %v89_v16 = vld [vmem:[#allocation2 + $0xc0] sm:$0xff] }
  0x48   :  { %256 = vmatpush1.msra.mxu0 %v193_v17  ;;  %1532 = vmatprep.subr.mxu1 %v1683_v0 }
  0x49   :  { %257 = vmatprep.subr.mxu0 %v1683_v0  ;;  %1564 = vmatpush1.msra.mxu1 %v193_v17  ;;  %v829_v17 = vld [vmem:[#allocation7 + $0x68] sm:$0xff] }
  0x4a   :  { %258 = vmatpush2.msra.mxu0 %v224_v18  ;;  %1533 = vmatprep.subr.mxu1 %v1683_v0 }
  0x4b   :  { %259 = vmatprep.subr.mxu0 %v1683_v0  ;;  %1565 = vmatpush2.msra.mxu1 %v224_v18  ;;  %v92_v18 = vld [vmem:[#allocation2 + $0xd8] sm:$0xff] }
  0x4c   :  { %260 = vmatpush2.msra.mxu0 %v223_v19  ;;  %1534 = vmatprep.subr.mxu1 %v1683_v0 }
  0x4d   :  { %261 = vmatprep.subr.mxu0 %v1683_v0  ;;  %1566 = vmatpush2.msra.mxu1 %v223_v19  ;;  %v182_v19 = vld [vmem:[#allocation2 + $0x3a8] sm:$0xff] }
  0x4e   :  { %262 = vmatpush2.msra.mxu0 %v222_v20  ;;  %1535 = vmatprep.subr.mxu1 %v1683_v0 }
  0x4f   :  { %263 = vmatprep.subr.mxu0 %v1683_v0  ;;  %1567 = vmatpush2.msra.mxu1 %v222_v20  ;;  %v828_v20 = vld [vmem:[#allocation7 + $0x60] sm:$0xff] }
  0x50   :  { %264 = vmatpush2.msra.mxu0 %v221_v21  ;;  %1536 = vmatprep.subr.mxu1 %v1683_v0 }
  0x51   :  { %265 = vmatprep.subr.mxu0 %v1683_v0  ;;  %1568 = vmatpush2.msra.mxu1 %v221_v21  ;;  %v181_v21 = vld [vmem:[#allocation2 + $0x3a0] sm:$0xff] }
  0x52   :  { %266 = vmatpush2.msra.mxu0 %v220_v22  ;;  %1537 = vmatprep.subr.mxu1 %v1683_v0 }
  0x53   :  { %267 = vmatprep.subr.mxu0 %v1683_v0  ;;  %1569 = vmatpush2.msra.mxu1 %v220_v22  ;;  %v91_v22 = vld [vmem:[#allocation2 + $0xd0] sm:$0xff] }
  0x54   :  { %268 = vmatpush2.msra.mxu0 %v219_v23  ;;  %1538 = vmatprep.subr.mxu1 %v1683_v0 }
  0x55   :  { %269 = vmatprep.subr.mxu0 %v1683_v0  ;;  %1570 = vmatpush2.msra.mxu1 %v219_v23  ;;  %v94_v23 = vld [vmem:[#allocation2 + $0xe8] sm:$0xff] }
  0x56   :  { %270 = vmatpush2.msra.mxu0 %v218_v24  ;;  %1539 = vmatprep.subr.mxu1 %v1683_v0 }
  0x57   :  { %271 = vmatprep.subr.mxu0 %v1683_v0  ;;  %1571 = vmatpush2.msra.mxu1 %v218_v24  ;;  %v827_v24 = vld [vmem:[#allocation7 + $0x58] sm:$0xff] }
  0x58   :  { %272 = vmatpush2.msra.mxu0 %v217_v25  ;;  %1540 = vmatprep.subr.mxu1 %v1683_v0 }
  0x59   :  { %273 = vmatprep.subr.mxu0 %v1683_v0  ;;  %1572 = vmatpush2.msra.mxu1 %v217_v25  ;;  %v184_v25 = vld [vmem:[#allocation2 + $0x3b8] sm:$0xff] }
  0x5a   :  { %274 = vmatpush2.msra.mxu0 %v216_v26  ;;  %1541 = vmatprep.subr.mxu1 %v1683_v0 }
  0x5b   :  { %275 = vmatprep.subr.mxu0 %v1683_v0  ;;  %1573 = vmatpush2.msra.mxu1 %v216_v26  ;;  %v826_v26 = vld [vmem:[#allocation7 + $0x50] sm:$0xff] }
  0x5c   :  { %276 = vmatpush2.msra.mxu0 %v215_v27  ;;  %1542 = vmatprep.subr.mxu1 %v1683_v0 }
  0x5d   :  { %277 = vmatprep.subr.mxu0 %v1683_v0  ;;  %1574 = vmatpush2.msra.mxu1 %v215_v27  ;;  %v183_v27 = vld [vmem:[#allocation2 + $0x3b0] sm:$0xff] }
  0x5e   :  { %278 = vmatpush2.msra.mxu0 %v214_v28  ;;  %1543 = vmatprep.subr.mxu1 %v1683_v0 }
  0x5f   :  { %279 = vmatprep.subr.mxu0 %v1683_v0  ;;  %1575 = vmatpush2.msra.mxu1 %v214_v28  ;;  %v93_v28 = vld [vmem:[#allocation2 + $0xe0] sm:$0xff] }
  0x60   :  { %280 = vmatpush2.msra.mxu0 %v213_v29  ;;  %1544 = vmatprep.subr.mxu1 %v1683_v0 }
  0x61   :  { %281 = vmatprep.subr.mxu0 %v1683_v0  ;;  %1576 = vmatpush2.msra.mxu1 %v213_v29  ;;  %v96_v29 = vld [vmem:[#allocation2 + $0xf8] sm:$0xff] }
  0x62   :  { %282 = vmatpush2.msra.mxu0 %v212_v30  ;;  %1545 = vmatprep.subr.mxu1 %v1683_v0 }
  0x63   :  { %283 = vmatprep.subr.mxu0 %v1683_v0  ;;  %1577 = vmatpush2.msra.mxu1 %v212_v30  ;;  %v825_v30 = vld [vmem:[#allocation7 + $0x48] sm:$0xff] }
  0x64   :  { %284 = vmatpush2.msra.mxu0 %v211_v31  ;;  %1546 = vmatprep.subr.mxu1 %v1683_v0 }
  0x65   :  { %285 = vmatprep.subr.mxu0 %v1683_v0  ;;  %1578 = vmatpush2.msra.mxu1 %v211_v31  ;;  %v186_v31 = vld [vmem:[#allocation2 + $0x3c8] sm:$0xff] }
  0x66   :  { %286 = vmatpush2.msra.mxu0 %v210_v32  ;;  %1547 = vmatprep.subr.mxu1 %v1683_v0 }
  0x67   :  { %287 = vmatprep.subr.mxu0 %v1683_v0  ;;  %1579 = vmatpush2.msra.mxu1 %v210_v32  ;;  %v824_v32 = vld [vmem:[#allocation7 + $0x40] sm:$0xff] }
  0x68   :  { %288 = vmatpush2.msra.mxu0 %v209_v33  ;;  %1548 = vmatprep.subr.mxu1 %v1683_v0  ;;  %v174_v0 = vld [vmem:[#allocation2 + $0x368] sm:$0xff] }
  0x69   :  { %290 = vmatmul.mubr.f32.vlgmr.msra.gmra.mxu0 %v65_v34  ;;  %1580 = vmatpush2.msra.mxu1 %v209_v33  ;;  %v185_v33 = vld [vmem:[#allocation2 + $0x3c0] sm:$0xff]  ;;  %v95_v34 = vld [vmem:[#allocation2 + $0xf0] sm:$0xff] }
  0x6a   :  { %294 = vmatprep.mubr.f32.mxu0 %v68_v35  ;;  %529 = vmatprep.mubr.f32.mxu1 %v162_v40  ;;  %v98_v35 = vld [vmem:[#allocation2 + $0x108] sm:$0xff]  ;;  %v97_v40 = vld [vmem:[#allocation2 + $0x100] sm:$0xff] }
  0x6b   :  { %530 = vmatmul.mubr.f32.vlgmr.msra.gmra.mxu1 %v161_v41  ;;  %1389 = vmatprep.subr.mxu1 %v831_v11  ;;  %v100_v41 = vld [vmem:[#allocation2 + $0x118] sm:$0xff] }
  0x6c   :  { %534 = vmatprep.mubr.f32.mxu1 %v164_v44  ;;  %1390 = vmatpush3.msra.mxu1 %v831_v11  ;;  %v820_v44 = vld [vmem:[#allocation7 + $0x20] sm:$0xff]  ;;  %v124_v11 = vld [vmem:[#allocation2 + $0x1d8] sm:$0xff] }
  0x6d   :  { %295 = vmatmul.mubr.f32.gmra.mxu0 %v67_v36  ;;  %1391 = vmatprep.subr.mxu1 %v830_v14  ;;  %v823_v36 = vld [vmem:[#allocation7 + $0x38] sm:$0xff] }
  0x6e   :  { %299 = vmatprep.mubr.f32.mxu0 %v70_v37  ;;  %1392 = vmatpush3.msra.mxu1 %v830_v14  ;;  %v188_v37 = vld [vmem:[#allocation2 + $0x3d8] sm:$0xff]  ;;  %v125_v14 = vld [vmem:[#allocation2 + $0x1e0] sm:$0xff] }
  0x6f   :  { %535 = vmatmul.mubr.f32.gmra.mxu1 %v163_v45  ;;  %1393 = vmatprep.subr.mxu1 %v829_v17  ;;  %v99_v45 = vld [vmem:[#allocation2 + $0x110] sm:$0xff] }
  0x70   :  { %539 = vmatprep.mubr.f32.mxu1 %v166_v48  ;;  %1394 = vmatpush3.msra.mxu1 %v829_v17  ;;  %v819_v48 = vld [vmem:[#allocation7 + $0x18] sm:$0xff]  ;;  %v130_v17 = vld [vmem:[#allocation2 + $0x208] sm:$0xff] }
  0x71   :  { %300 = vmatmul.mubr.f32.gmra.mxu0 %v69_v38  ;;  %1395 = vmatprep.subr.mxu1 %v828_v20  ;;  %v822_v38 = vld [vmem:[#allocation7 + $0x30] sm:$0xff] }
  0x72   :  { %304 = vmatprep.mubr.f32.mxu0 %v72_v39  ;;  %1396 = vmatpush3.msra.mxu1 %v828_v20  ;;  %v187_v39 = vld [vmem:[#allocation2 + $0x3d0] sm:$0xff] }
  0x73   :  { %540 = vmatmul.mubr.f32.gmra.mxu1 %v165_v49  ;;  %1397 = vmatprep.subr.mxu1 %v827_v24  ;;  %v192_v49 = vld [vmem:[#allocation2 + $0x3f8] sm:$0xff]  ;;  %v131_v20 = vld [vmem:[#allocation2 + $0x210] sm:$0xff] }
  0x74   :  { %544 = vmatprep.mubr.f32.mxu1 %v168_v52  ;;  %1398 = vmatpush3.msra.mxu1 %v827_v24  ;;  %v191_v52 = vld [vmem:[#allocation2 + $0x3f0] sm:$0xff] }
  0x75   :  { %305 = vmatmul.mubr.f32.gmra.mxu0 %v71_v42  ;;  %1399 = vmatprep.subr.mxu1 %v826_v26  ;;  %v821_v42 = vld [vmem:[#allocation7 + $0x28] sm:$0xff]  ;;  %v135_v24 = vld [vmem:[#allocation2 + $0x230] sm:$0xff] }
  0x76   :  { %309 = vmatprep.mubr.f32.mxu0 %v74_v43  ;;  %1400 = vmatpush3.msra.mxu1 %v826_v26  ;;  %v190_v43 = vld [vmem:[#allocation2 + $0x3e8] sm:$0xff]  ;;  %v137_v26 = vld [vmem:[#allocation2 + $0x240] sm:$0xff] }
  0x77   :  { %545 = vmatmul.mubr.f32.gmra.mxu1 %v167_v53  ;;  %1401 = vmatprep.subr.mxu1 %v825_v30  ;;  %v104_v53 = vld [vmem:[#allocation2 + $0x138] sm:$0xff] }
  0x78   :  { %549 = vmatprep.mubr.f32.mxu1 %v170_v56  ;;  %1402 = vmatpush3.msra.mxu1 %v825_v30  ;;  %v103_v56 = vld [vmem:[#allocation2 + $0x130] sm:$0xff]  ;;  %v141_v30 = vld [vmem:[#allocation2 + $0x260] sm:$0xff] }
  0x79   :  { %310 = vmatmul.mubr.f32.gmra.mxu0 %v73_v46  ;;  %1403 = vmatprep.subr.mxu1 %v824_v32  ;;  %v189_v46 = vld [vmem:[#allocation2 + $0x3e0] sm:$0xff] }
  0x7a   :  { %314 = vmatprep.mubr.f32.mxu0 %v76_v47  ;;  %1404 = vmatpush3.msra.mxu1 %v824_v32  ;;  %v102_v47 = vld [vmem:[#allocation2 + $0x128] sm:$0xff]  ;;  %v143_v32 = vld [vmem:[#allocation2 + $0x270] sm:$0xff] }
  0x7b   :  { %550 = vmatmul.mubr.f32.gmra.mxu1 %v169_v57  ;;  %1405 = vmatprep.subr.mxu1 %v823_v36  ;;  %v106_v57 = vld [vmem:[#allocation2 + $0x148] sm:$0xff] }
  0x7c   :  { %554 = vmatprep.mubr.f32.mxu1 %v172_v60  ;;  %1406 = vmatpush3.msra.mxu1 %v823_v36  ;;  %v107_v60 = vld [vmem:[#allocation2 + $0x150] sm:$0xff] }
  0x7d   :  { %315 = vmatmul.mubr.f32.gmra.mxu0 %v75_v50  ;;  %1407 = vmatprep.subr.mxu1 %v822_v38  ;;  %v818_v50 = vld [vmem:[#allocation7 + $0x10] sm:$0xff] }
  0x7e   :  { %319 = vmatprep.mubr.f32.mxu0 %v78_v51  ;;  %1408 = vmatpush3.msra.mxu1 %v822_v38  ;;  %v101_v51 = vld [vmem:[#allocation2 + $0x120] sm:$0xff]  ;;  %v147_v36 = vld [vmem:[#allocation2 + $0x290] sm:$0xff] }
  0x7f   :  { %555 = vmatmul.mubr.f32.gmra.mxu1 %v171_v61  ;;  %1409 = vmatprep.subr.mxu1 %v821_v42  ;;  %v110_v61 = vld [vmem:[#allocation2 + $0x168] sm:$0xff]  ;;  %v149_v38 = vld [vmem:[#allocation2 + $0x2a0] sm:$0xff] }
  0x80   :  { %559 = vmatprep.mubr.f32.mxu1 %v174_v0  ;;  %1410 = vmatpush3.msra.mxu1 %v821_v42  ;;  %v111_v0 = vld [vmem:[#allocation2 + $0x170] sm:$0xff]  ;;  %v153_v42 = vld [vmem:[#allocation2 + $0x2c0] sm:$0xff] }
  0x81   :  { %320 = vmatmul.mubr.f32.gmra.mxu0 %v77_v54  ;;  %1411 = vmatprep.subr.mxu1 %v820_v44  ;;  %v817_v54 = vld [vmem:[#allocation7 + $0x8] sm:$0xff] }
  0x82   :  { %324 = vmatprep.mubr.f32.mxu0 %v80_v55  ;;  %1412 = vmatpush3.msra.mxu1 %v820_v44  ;;  %v816_v55 = vld [vmem:[#allocation7] sm:$0xff]  ;;  %v155_v44 = vld [vmem:[#allocation2 + $0x2d0] sm:$0xff] }
  0x83   :  { %560 = vmatmul.mubr.f32.gmra.mxu1 %v173_v1  ;;  %1413 = vmatprep.subr.mxu1 %v819_v48  ;;  %v114_v1 = vld [vmem:[#allocation2 + $0x188] sm:$0xff] }
  0x84   :  { %564 = vmatprep.mubr.f32.mxu1 %v176_v4  ;;  %1414 = vmatpush3.msra.mxu1 %v819_v48  ;;  %v115_v4 = vld [vmem:[#allocation2 + $0x190] sm:$0xff] }
  0x85   :  { %325 = vmatmul.mubr.f32.gmra.mxu0 %v79_v58  ;;  %1415 = vmatprep.subr.mxu1 %v818_v50  ;;  %v105_v58 = vld [vmem:[#allocation2 + $0x140] sm:$0xff]  ;;  %v159_v48 = vld [vmem:[#allocation2 + $0x2f0] sm:$0xff] }
  0x86   :  { %329 = vmatprep.mubr.f32.mxu0 %v82_v59  ;;  %1416 = vmatpush3.msra.mxu1 %v818_v50  ;;  %v108_v59 = vld [vmem:[#allocation2 + $0x158] sm:$0xff] }
  0x87   :  { %565 = vmatmul.mubr.f32.gmra.mxu1 %v175_v5  ;;  %1417 = vmatprep.subr.mxu1 %v817_v54  ;;  %v118_v5 = vld [vmem:[#allocation2 + $0x1a8] sm:$0xff] }
  0x88   :  { %569 = vmatprep.mubr.f32.mxu1 %v178_v8  ;;  %1418 = vmatpush3.msra.mxu1 %v817_v54  ;;  %v119_v8 = vld [vmem:[#allocation2 + $0x1b0] sm:$0xff] }
  0x89   :  { %330 = vmatmul.mubr.f32.gmra.mxu0 %v81_v62  ;;  %1419 = vmatprep.subr.mxu1 %v816_v55  ;;  %v109_v62 = vld [vmem:[#allocation2 + $0x160] sm:$0xff] }
  0x8a   :  { %334 = vmatprep.mubr.f32.mxu0 %v84_v63  ;;  %1420 = vmatpush3.msra.mxu1 %v816_v55  ;;  %v112_v63 = vld [vmem:[#allocation2 + $0x178] sm:$0xff] }
  0x8b   :  { %570 = vmatmul.mubr.f32.gmra.mxu1 %v177_v9  ;;  %v122_v9 = vld [vmem:[#allocation2 + $0x1c8] sm:$0xff] }
  0x8c   :  { %574 = vmatprep.mubr.f32.mxu1 %v180_v13  ;;  %v126_v13 = vld [vmem:[#allocation2 + $0x1e8] sm:$0xff] }
  0x8d   :  { %335 = vmatmul.mubr.f32.gmra.mxu0 %v83_v2  ;;  %v113_v2 = vld [vmem:[#allocation2 + $0x180] sm:$0xff] }
  0x8e   :  { %339 = vmatprep.mubr.f32.mxu0 %v86_v3  ;;  %v116_v3 = vld [vmem:[#allocation2 + $0x198] sm:$0xff] }
  0x8f   :  { %575 = vmatmul.mubr.f32.gmra.mxu1 %v179_v15  ;;  %v128_v15 = vld [vmem:[#allocation2 + $0x1f8] sm:$0xff] }
  0x90   :  { %579 = vmatprep.mubr.f32.mxu1 %v182_v19  ;;  %v132_v19 = vld [vmem:[#allocation2 + $0x218] sm:$0xff] }
  0x91   :  { %340 = vmatmul.mubr.f32.gmra.mxu0 %v85_v6  ;;  %v117_v6 = vld [vmem:[#allocation2 + $0x1a0] sm:$0xff] }
  0x92   :  { %344 = vmatprep.mubr.f32.mxu0 %v88_v7  ;;  %v120_v7 = vld [vmem:[#allocation2 + $0x1b8] sm:$0xff] }
  0x93   :  { %580 = vmatmul.mubr.f32.gmra.mxu1 %v181_v21  ;;  %v134_v21 = vld [vmem:[#allocation2 + $0x228] sm:$0xff] }
  0x94   :  { %584 = vmatprep.mubr.f32.mxu1 %v184_v25  ;;  %v138_v25 = vld [vmem:[#allocation2 + $0x248] sm:$0xff] }
  0x95   :  { %345 = vmatmul.mubr.f32.gmra.mxu0 %v87_v10  ;;  %v121_v10 = vld [vmem:[#allocation2 + $0x1c0] sm:$0xff] }
  0x96   :  { %349 = vmatprep.mubr.f32.mxu0 %v90_v12  ;;  %v123_v12 = vld [vmem:[#allocation2 + $0x1d0] sm:$0xff] }
  0x97   :  { %585 = vmatmul.mubr.f32.gmra.mxu1 %v183_v27  ;;  %v140_v27 = vld [vmem:[#allocation2 + $0x258] sm:$0xff] }
  0x98   :  { %589 = vmatprep.mubr.f32.mxu1 %v186_v31  ;;  %v144_v31 = vld [vmem:[#allocation2 + $0x278] sm:$0xff] }
  0x99   :  { %350 = vmatmul.mubr.f32.gmra.mxu0 %v89_v16  ;;  %v127_v16 = vld [vmem:[#allocation2 + $0x1f0] sm:$0xff] }
  0x9a   :  { %354 = vmatprep.mubr.f32.mxu0 %v92_v18  ;;  %v129_v18 = vld [vmem:[#allocation2 + $0x200] sm:$0xff] }
  0x9b   :  { %590 = vmatmul.mubr.f32.gmra.mxu1 %v185_v33  ;;  %v146_v33 = vld [vmem:[#allocation2 + $0x288] sm:$0xff] }
  0x9c   :  { %594 = vmatprep.mubr.f32.mxu1 %v188_v37  ;;  %v150_v37 = vld [vmem:[#allocation2 + $0x2a8] sm:$0xff] }
  0x9d   :  { %355 = vmatmul.mubr.f32.gmra.mxu0 %v91_v22  ;;  %v133_v22 = vld [vmem:[#allocation2 + $0x220] sm:$0xff] }
  0x9e   :  { %359 = vmatprep.mubr.f32.mxu0 %v94_v23  ;;  %v136_v23 = vld [vmem:[#allocation2 + $0x238] sm:$0xff] }
  0x9f   :  { %595 = vmatmul.mubr.f32.gmra.mxu1 %v187_v39  ;;  %v152_v39 = vld [vmem:[#allocation2 + $0x2b8] sm:$0xff] }
  0xa0   :  { %599 = vmatprep.mubr.f32.mxu1 %v190_v43  ;;  %v156_v43 = vld [vmem:[#allocation2 + $0x2d8] sm:$0xff] }
  0xa1   :  { %360 = vmatmul.mubr.f32.gmra.mxu0 %v93_v28  ;;  %v139_v28 = vld [vmem:[#allocation2 + $0x250] sm:$0xff] }
  0xa2   :  { %364 = vmatprep.mubr.f32.mxu0 %v96_v29  ;;  %v142_v29 = vld [vmem:[#allocation2 + $0x268] sm:$0xff] }
  0xa3   :  { %600 = vmatmul.mubr.f32.gmra.mxu1 %v189_v46  ;;  %v157_v46 = vld [vmem:[#allocation2 + $0x2e0] sm:$0xff] }
  0xa4   :  { %604 = vmatprep.mubr.f32.mxu1 %v192_v49  ;;  %v1802_v49 = vld [vmem:[%s2062_s2] ss:$0 sm:$0xff] }
  0xa5   :  { %365 = vmatmul.mubr.f32.gmra.mxu0 %v95_v34  ;;  %v145_v34 = vld [vmem:[#allocation2 + $0x280] sm:$0xff] }
  0xa6   :  { %369 = vmatprep.mubr.f32.mxu0 %v98_v35  ;;  %v148_v35 = vld [vmem:[#allocation2 + $0x298] sm:$0xff] }
  0xa7   :  { %605 = vmatmul.mubr.f32.gmra.mxu1 %v191_v52 }
  0xa9   :  { %370 = vmatmul.mubr.f32.gmra.mxu0 %v97_v40  ;;  %v151_v40 = vld [vmem:[#allocation2 + $0x2b0] sm:$0xff] }
  0xaa   :  { %374 = vmatprep.mubr.f32.mxu0 %v100_v41  ;;  %v154_v41 = vld [vmem:[#allocation2 + $0x2c8] sm:$0xff] }
  0xad   :  { %375 = vmatmul.mubr.f32.gmra.mxu0 %v99_v45  ;;  %v158_v45 = vld [vmem:[#allocation2 + $0x2e8] sm:$0xff] }
  0xae   :  { %379 = vmatprep.mubr.f32.mxu0 %v102_v47  ;;  %v160_v47 = vld [vmem:[#allocation2 + $0x2f8] sm:$0xff] }
  0xb1   :  { %380 = vmatmul.mubr.f32.gmra.mxu0 %v101_v51  ;;  %v1807_v51 = vld [vmem:[%s2063_s3] ss:$0 sm:$0xff] }
  0xb2   :  { %384 = vmatprep.mubr.f32.mxu0 %v104_v53 }
  0xb5   :  { %385 = vmatmul.mubr.f32.gmra.mxu0 %v103_v56 }
  0xb6   :  { %389 = vmatprep.mubr.f32.mxu0 %v106_v57 }
  0xb9   :  { %390 = vmatmul.mubr.f32.gmra.mxu0 %v105_v58 }
  0xba   :  { %394 = vmatprep.mubr.f32.mxu0 %v108_v59 }
  0xbd   :  { %395 = vmatmul.mubr.f32.gmra.mxu0 %v107_v60 }
  0xbe   :  { %399 = vmatprep.mubr.f32.mxu0 %v110_v61 }
  0xc1   :  { %400 = vmatmul.mubr.f32.gmra.mxu0 %v109_v62 }
  0xc2   :  { %404 = vmatprep.mubr.f32.mxu0 %v112_v63 }
  0xc5   :  { %405 = vmatmul.mubr.f32.gmra.mxu0 %v111_v0 }
  0xc6   :  { %409 = vmatprep.mubr.f32.mxu0 %v114_v1 }
  0xc9   :  { %410 = vmatmul.mubr.f32.gmra.mxu0 %v113_v2 }
  0xca   :  { %414 = vmatprep.mubr.f32.mxu0 %v116_v3 }
  0xcd   :  { %415 = vmatmul.mubr.f32.gmra.mxu0 %v115_v4 }
  0xce   :  { %419 = vmatprep.mubr.f32.mxu0 %v118_v5 }
  0xd1   :  { %420 = vmatmul.mubr.f32.gmra.mxu0 %v117_v6 }
  0xd2   :  { %424 = vmatprep.mubr.f32.mxu0 %v120_v7 }
  0xd5   :  { %425 = vmatmul.mubr.f32.gmra.mxu0 %v119_v8 }
  0xd6   :  { %429 = vmatprep.mubr.f32.mxu0 %v122_v9 }
  0xd9   :  { %430 = vmatmul.mubr.f32.gmra.mxu0 %v121_v10 }
  0xda   :  { %434 = vmatprep.mubr.f32.mxu0 %v124_v11 }
  0xdd   :  { %435 = vmatmul.mubr.f32.gmra.mxu0 %v123_v12 }
  0xde   :  { %439 = vmatprep.mubr.f32.mxu0 %v126_v13 }
  0xe1   :  { %440 = vmatmul.mubr.f32.gmra.mxu0 %v125_v14 }
  0xe2   :  { %444 = vmatprep.mubr.f32.mxu0 %v128_v15 }
  0xe5   :  { %445 = vmatmul.mubr.f32.gmra.mxu0 %v127_v16 }
  0xe6   :  { %449 = vmatprep.mubr.f32.mxu0 %v130_v17 }
  0xe9   :  { %450 = vmatmul.mubr.f32.gmra.mxu0 %v129_v18 }
  0xea   :  { %454 = vmatprep.mubr.f32.mxu0 %v132_v19 }
  0xed   :  { %455 = vmatmul.mubr.f32.gmra.mxu0 %v131_v20 }
  0xee   :  { %459 = vmatprep.mubr.f32.mxu0 %v134_v21 }
  0xf1   :  { %460 = vmatmul.mubr.f32.gmra.mxu0 %v133_v22 }
  0xf2   :  { %464 = vmatprep.mubr.f32.mxu0 %v136_v23 }
  0xf5   :  { %465 = vmatmul.mubr.f32.gmra.mxu0 %v135_v24 }
  0xf6   :  { %469 = vmatprep.mubr.f32.mxu0 %v138_v25 }
  0xf9   :  { %470 = vmatmul.mubr.f32.gmra.mxu0 %v137_v26 }
  0xfa   :  { %474 = vmatprep.mubr.f32.mxu0 %v140_v27 }
  0xfd   :  { %475 = vmatmul.mubr.f32.gmra.mxu0 %v139_v28 }
  0xfe   :  { %479 = vmatprep.mubr.f32.mxu0 %v142_v29 }
 0x101   :  { %480 = vmatmul.mubr.f32.gmra.mxu0 %v141_v30 }
 0x102   :  { %484 = vmatprep.mubr.f32.mxu0 %v144_v31 }
 0x105   :  { %485 = vmatmul.mubr.f32.gmra.mxu0 %v143_v32 }
 0x106   :  { %489 = vmatprep.mubr.f32.mxu0 %v146_v33 }
 0x109   :  { %490 = vmatmul.mubr.f32.gmra.mxu0 %v145_v34 }
 0x10a   :  { %494 = vmatprep.mubr.f32.mxu0 %v148_v35 }
 0x10d   :  { %495 = vmatmul.mubr.f32.gmra.mxu0 %v147_v36 }
 0x10e   :  { %499 = vmatprep.mubr.f32.mxu0 %v150_v37 }
 0x111   :  { %500 = vmatmul.mubr.f32.gmra.mxu0 %v149_v38 }
 0x112   :  { %504 = vmatprep.mubr.f32.mxu0 %v152_v39 }
 0x115   :  { %505 = vmatmul.mubr.f32.gmra.mxu0 %v151_v40 }
 0x116   :  { %509 = vmatprep.mubr.f32.mxu0 %v154_v41 }
 0x119   :  { %510 = vmatmul.mubr.f32.gmra.mxu0 %v153_v42 }
 0x11a   :  { %514 = vmatprep.mubr.f32.mxu0 %v156_v43 }
 0x11d   :  { %515 = vmatmul.mubr.f32.gmra.mxu0 %v155_v44 }
 0x11e   :  { %519 = vmatprep.mubr.f32.mxu0 %v158_v45 }
 0x121   :  { %520 = vmatmul.mubr.f32.gmra.mxu0 %v157_v46 }
 0x122   :  { %524 = vmatprep.mubr.f32.mxu0 %v160_v47 }
 0x125   :  { %525 = vmatmul.mubr.f32.gmra.mxu0 %v159_v48 }
 0x129   :  { %v291_v50 = vpop.f32.mrf.mxu0 }
 0x12a   :  { %v617_v52 = vmul.f32 %v1802_v49, %v291_v50 }
 0x12b   :  { %v293_v53 = vpop.f32.mrf.mxu0  ;;  %v1815_v1 = vpop.f32.mrf.mxu1 }
 0x12c   :  { %v688_v54 = vadd.f32 %v1807_v51, %v617_v52 }
 0x12d   :  { %v296_v55 = vpop.f32.mrf.mxu0  ;;  %v533_v5 = vpop.f32.mrf.mxu1 }
 0x12e   :  { %v752_v56 = vmax.f32 %v688_v54, 0.0  ;;  %v618_v57 = vmul.f32 %v1802_v49, %v296_v55 }
 0x12f   :  { %v298_v58 = vpop.f32.mrf.mxu0  ;;  %v1819_v8 = vpop.f32.mrf.mxu1 }
 0x130   :  { %v689_v59 = vadd.f32 %v1807_v51, %v618_v57  ;;  %1421 = vmatprep.mubr.f32.mxu1 %v752_v56 }
 0x131   :  { %v301_v60 = vpop.f32.mrf.mxu0  ;;  %v538_v12 = vpop.f32.mrf.mxu1 }
 0x132   :  { %v753_v61 = vmax.f32 %v689_v59, 0.0  ;;  %v619_v62 = vmul.f32 %v1802_v49, %v301_v60 }
 0x133   :  { %v303_v63 = vpop.f32.mrf.mxu0  ;;  %v1823_v15 = vpop.f32.mrf.mxu1 }
 0x134   :  { %v690_v0 = vadd.f32 %v1807_v51, %v619_v62  ;;  %1422 = vmatmul.mubr.f32.vlgmr.msra.gmra.mxu1 %v753_v61 }
 0x135   :  { %v306_v2 = vpop.f32.mrf.mxu0  ;;  %v543_v19 = vpop.f32.mrf.mxu1 }
 0x136   :  { %v754_v3 = vmax.f32 %v690_v0, 0.0  ;;  %v620_v4 = vmul.f32 %v1802_v49, %v306_v2 }
 0x137   :  { %v308_v6 = vpop.f32.mrf.mxu0  ;;  %v1827_v22 = vpop.f32.mrf.mxu1 }
 0x138   :  { %v691_v7 = vadd.f32 %v1807_v51, %v620_v4  ;;  %1424 = vmatprep.mubr.f32.mxu1 %v754_v3 }
 0x139   :  { %v311_v9 = vpop.f32.mrf.mxu0  ;;  %v548_v26 = vpop.f32.mrf.mxu1 }
 0x13a   :  { %v755_v10 = vmax.f32 %v691_v7, 0.0  ;;  %v621_v11 = vmul.f32 %v1802_v49, %v311_v9 }
 0x13b   :  { %v313_v13 = vpop.f32.mrf.mxu0  ;;  %v1831_v29 = vpop.f32.mrf.mxu1 }
 0x13c   :  { %v692_v14 = vadd.f32 %v1807_v51, %v621_v11  ;;  %1425 = vmatmul.mubr.f32.gmra.mxu1 %v755_v10 }
 0x13d   :  { %v316_v16 = vpop.f32.mrf.mxu0  ;;  %v553_v33 = vpop.f32.mrf.mxu1 }
 0x13e   :  { %v756_v17 = vmax.f32 %v692_v14, 0.0  ;;  %v622_v18 = vmul.f32 %v1802_v49, %v316_v16 }
 0x13f   :  { %v318_v20 = vpop.f32.mrf.mxu0  ;;  %v1835_v36 = vpop.f32.mrf.mxu1 }
 0x140   :  { %v693_v21 = vadd.f32 %v1807_v51, %v622_v18  ;;  %1427 = vmatprep.mubr.f32.mxu1 %v756_v17 }
 0x141   :  { %v321_v23 = vpop.f32.mrf.mxu0  ;;  %v558_v40 = vpop.f32.mrf.mxu1 }
 0x142   :  { %v757_v24 = vmax.f32 %v693_v21, 0.0  ;;  %v623_v25 = vmul.f32 %v1802_v49, %v321_v23 }
 0x143   :  { %v323_v27 = vpop.f32.mrf.mxu0  ;;  %v1839_v43 = vpop.f32.mrf.mxu1 }
 0x144   :  { %v694_v28 = vadd.f32 %v1807_v51, %v623_v25  ;;  %1428 = vmatmul.mubr.f32.gmra.mxu1 %v757_v24 }
 0x145   :  { %v326_v30 = vpop.f32.mrf.mxu0  ;;  %v563_v47 = vpop.f32.mrf.mxu1 }
 0x146   :  { %v758_v31 = vmax.f32 %v694_v28, 0.0  ;;  %v624_v32 = vmul.f32 %v1802_v49, %v326_v30 }
 0x147   :  { %v328_v34 = vpop.f32.mrf.mxu0  ;;  %v1843_v52 = vpop.f32.mrf.mxu1 }
 0x148   :  { %v695_v35 = vadd.f32 %v1807_v51, %v624_v32  ;;  %1430 = vmatprep.mubr.f32.mxu1 %v758_v31 }
 0x149   :  { %v331_v37 = vpop.f32.mrf.mxu0  ;;  %v568_v56 = vpop.f32.mrf.mxu1 }
 0x14a   :  { %v759_v38 = vmax.f32 %v695_v35, 0.0  ;;  %v625_v39 = vmul.f32 %v1802_v49, %v331_v37 }
 0x14b   :  { %v333_v41 = vpop.f32.mrf.mxu0  ;;  %v1847_v59 = vpop.f32.mrf.mxu1 }
 0x14c   :  { %v696_v42 = vadd.f32 %v1807_v51, %v625_v39  ;;  %1431 = vmatmul.mubr.f32.gmra.mxu1 %v759_v38 }
 0x14d   :  { %v336_v44 = vpop.f32.mrf.mxu0  ;;  %v573_v63 = vpop.f32.mrf.mxu1 }
 0x14e   :  { %v760_v45 = vmax.f32 %v696_v42, 0.0  ;;  %v626_v46 = vmul.f32 %v1802_v49, %v336_v44 }
 0x14f   :  { %v338_v48 = vpop.f32.mrf.mxu0  ;;  %v1851_v3 = vpop.f32.mrf.mxu1 }
 0x150   :  { %v697_v50 = vadd.f32 %v1807_v51, %v626_v46  ;;  %1433 = vmatprep.mubr.f32.mxu1 %v760_v45 }
 0x151   :  { %v341_v53 = vpop.f32.mrf.mxu0  ;;  %v578_v7 = vpop.f32.mrf.mxu1 }
 0x152   :  { %v761_v54 = vmax.f32 %v697_v50, 0.0  ;;  %v627_v55 = vmul.f32 %v1802_v49, %v341_v53 }
 0x153   :  { %v343_v57 = vpop.f32.mrf.mxu0  ;;  %v1855_v11 = vpop.f32.mrf.mxu1 }
 0x154   :  { %v698_v58 = vadd.f32 %v1807_v51, %v627_v55  ;;  %1434 = vmatmul.mubr.f32.gmra.mxu1 %v761_v54 }
 0x155   :  { %v346_v60 = vpop.f32.mrf.mxu0  ;;  %v583_v16 = vpop.f32.mrf.mxu1 }
 0x156   :  { %v762_v61 = vmax.f32 %v698_v58, 0.0  ;;  %v628_v62 = vmul.f32 %v1802_v49, %v346_v60 }
 0x157   :  { %v348_v0 = vpop.f32.mrf.mxu0  ;;  %v1859_v19 = vpop.f32.mrf.mxu1 }
 0x158   :  { %v699_v2 = vadd.f32 %v1807_v51, %v628_v62  ;;  %1436 = vmatprep.mubr.f32.mxu1 %v762_v61 }
 0x159   :  { %v351_v4 = vpop.f32.mrf.mxu0  ;;  %v588_v24 = vpop.f32.mrf.mxu1 }
 0x15a   :  { %v763_v5 = vmax.f32 %v699_v2, 0.0  ;;  %v629_v6 = vmul.f32 %v1802_v49, %v351_v4 }
 0x15b   :  { %v353_v9 = vpop.f32.mrf.mxu0  ;;  %v1863_v27 = vpop.f32.mrf.mxu1 }
 0x15c   :  { %v700_v10 = vadd.f32 %v1807_v51, %v629_v6  ;;  %1437 = vmatmul.mubr.f32.gmra.mxu1 %v763_v5 }
 0x15d   :  { %v356_v12 = vpop.f32.mrf.mxu0  ;;  %v593_v32 = vpop.f32.mrf.mxu1 }
 0x15e   :  { %v764_v13 = vmax.f32 %v700_v10, 0.0  ;;  %v630_v14 = vmul.f32 %v1802_v49, %v356_v12 }
 0x15f   :  { %v358_v17 = vpop.f32.mrf.mxu0  ;;  %v1867_v35 = vpop.f32.mrf.mxu1 }
 0x160   :  { %v701_v18 = vadd.f32 %v1807_v51, %v630_v14  ;;  %1439 = vmatprep.mubr.f32.mxu1 %v764_v13 }
 0x161   :  { %v361_v20 = vpop.f32.mrf.mxu0  ;;  %v598_v40 = vpop.f32.mrf.mxu1 }
 0x162   :  { %v765_v21 = vmax.f32 %v701_v18, 0.0  ;;  %v631_v23 = vmul.f32 %v1802_v49, %v361_v20 }
 0x163   :  { %v363_v25 = vpop.f32.mrf.mxu0  ;;  %v1871_v44 = vpop.f32.mrf.mxu1 }
 0x164   :  { %v702_v26 = vadd.f32 %v1807_v51, %v631_v23  ;;  %1440 = vmatmul.mubr.f32.gmra.mxu1 %v765_v21 }
 0x165   :  { %v366_v28 = vpop.f32.mrf.mxu0  ;;  %v603_v48 = vpop.f32.mrf.mxu1 }
 0x166   :  { %v766_v30 = vmax.f32 %v702_v26, 0.0  ;;  %v632_v31 = vmul.f32 %v1802_v49, %v366_v28 }
 0x167   :  { %v368_v33 = vpop.f32.mrf.mxu0  ;;  %v1875_v54 = vpop.f32.mrf.mxu1 }
 0x168   :  { %v703_v34 = vadd.f32 %v1807_v51, %v632_v31  ;;  %1442 = vmatprep.mubr.f32.mxu1 %v766_v30 }
 0x169   :  { %v371_v37 = vpop.f32.mrf.mxu0  ;;  %v608_v58 = vpop.f32.mrf.mxu1 }
 0x16a   :  { %v767_v38 = vmax.f32 %v703_v34, 0.0  ;;  %v633_v39 = vmul.f32 %v1802_v49, %v371_v37 }
 0x16b   :  { %v373_v41 = vpop.f32.mrf.mxu0 }
 0x16c   :  { %v704_v42 = vadd.f32 %v1807_v51, %v633_v39  ;;  %1443 = vmatmul.mubr.f32.gmra.mxu1 %v767_v38 }
 0x16d   :  { %v376_v45 = vpop.f32.mrf.mxu0 }
 0x16e   :  { %v768_v46 = vmax.f32 %v704_v42, 0.0  ;;  %v634_v47 = vmul.f32 %v1802_v49, %v376_v45 }
 0x16f   :  { %v378_v50 = vpop.f32.mrf.mxu0 }
 0x170   :  { %v705_v53 = vadd.f32 %v1807_v51, %v634_v47  ;;  %1445 = vmatprep.mubr.f32.mxu1 %v768_v46 }
 0x171   :  { %v381_v55 = vpop.f32.mrf.mxu0 }
 0x172   :  { %v769_v56 = vmax.f32 %v705_v53, 0.0  ;;  %v635_v57 = vmul.f32 %v1802_v49, %v381_v55 }
 0x173   :  { %v383_v60 = vpop.f32.mrf.mxu0 }
 0x174   :  { %v706_v61 = vadd.f32 %v1807_v51, %v635_v57  ;;  %1446 = vmatmul.mubr.f32.gmra.mxu1 %v769_v56 }
 0x175   :  { %v386_v62 = vpop.f32.mrf.mxu0 }
 0x176   :  { %v770_v63 = vmax.f32 %v706_v61, 0.0  ;;  %v636_v0 = vmul.f32 %v1802_v49, %v386_v62 }
 0x177   :  { %v388_v2 = vpop.f32.mrf.mxu0 }
 0x178   :  { %v707_v4 = vadd.f32 %v1807_v51, %v636_v0  ;;  %1448 = vmatprep.mubr.f32.mxu1 %v770_v63 }
 0x179   :  { %v391_v5 = vpop.f32.mrf.mxu0 }
 0x17a   :  { %v771_v6 = vmax.f32 %v707_v4, 0.0  ;;  %v637_v7 = vmul.f32 %v1802_v49, %v391_v5 }
 0x17b   :  { %v393_v9 = vpop.f32.mrf.mxu0 }
 0x17c   :  { %v708_v10 = vadd.f32 %v1807_v51, %v637_v7  ;;  %1449 = vmatmul.mubr.f32.gmra.mxu1 %v771_v6 }
 0x17d   :  { %v396_v12 = vpop.f32.mrf.mxu0 }
 0x17e   :  { %v772_v13 = vmax.f32 %v708_v10, 0.0  ;;  %v638_v14 = vmul.f32 %v1802_v49, %v396_v12 }
 0x17f   :  { %v398_v16 = vpop.f32.mrf.mxu0 }
 0x180   :  { %v709_v17 = vadd.f32 %v1807_v51, %v638_v14  ;;  %1451 = vmatprep.mubr.f32.mxu1 %v772_v13 }
 0x181   :  { %v401_v18 = vpop.f32.mrf.mxu0 }
 0x182   :  { %v773_v20 = vmax.f32 %v709_v17, 0.0  ;;  %v639_v21 = vmul.f32 %v1802_v49, %v401_v18 }
 0x183   :  { %v403_v23 = vpop.f32.mrf.mxu0 }
 0x184   :  { %v710_v24 = vadd.f32 %v1807_v51, %v639_v21  ;;  %1452 = vmatmul.mubr.f32.gmra.mxu1 %v773_v20 }
 0x185   :  { %v406_v25 = vpop.f32.mrf.mxu0 }
 0x186   :  { %v774_v26 = vmax.f32 %v710_v24, 0.0  ;;  %v640_v28 = vmul.f32 %v1802_v49, %v406_v25 }
 0x187   :  { %v408_v30 = vpop.f32.mrf.mxu0 }
 0x188   :  { %v711_v31 = vadd.f32 %v1807_v51, %v640_v28  ;;  %1454 = vmatprep.mubr.f32.mxu1 %v774_v26 }
 0x189   :  { %v411_v32 = vpop.f32.mrf.mxu0 }
 0x18a   :  { %v775_v33 = vmax.f32 %v711_v31, 0.0  ;;  %v641_v34 = vmul.f32 %v1802_v49, %v411_v32 }
 0x18b   :  { %v413_v37 = vpop.f32.mrf.mxu0 }
 0x18c   :  { %v712_v38 = vadd.f32 %v1807_v51, %v641_v34  ;;  %1455 = vmatmul.mubr.f32.gmra.mxu1 %v775_v33 }
 0x18d   :  { %v416_v39 = vpop.f32.mrf.mxu0 }
 0x18e   :  { %v776_v40 = vmax.f32 %v712_v38, 0.0  ;;  %v642_v41 = vmul.f32 %v1802_v49, %v416_v39 }
 0x18f   :  { %v418_v42 = vpop.f32.mrf.mxu0 }
 0x190   :  { %v713_v45 = vadd.f32 %v1807_v51, %v642_v41  ;;  %1457 = vmatprep.mubr.f32.mxu1 %v776_v40 }
 0x191   :  { %v421_v46 = vpop.f32.mrf.mxu0 }
 0x192   :  { %v777_v47 = vmax.f32 %v713_v45, 0.0  ;;  %v643_v48 = vmul.f32 %v1802_v49, %v421_v46 }
 0x193   :  { %v423_v50 = vpop.f32.mrf.mxu0 }
 0x194   :  { %v714_v53 = vadd.f32 %v1807_v51, %v643_v48  ;;  %1458 = vmatmul.mubr.f32.gmra.mxu1 %v777_v47 }
 0x195   :  { %v426_v55 = vpop.f32.mrf.mxu0 }
 0x196   :  { %v778_v56 = vmax.f32 %v714_v53, 0.0  ;;  %v644_v57 = vmul.f32 %v1802_v49, %v426_v55 }
 0x197   :  { %v428_v58 = vpop.f32.mrf.mxu0 }
 0x198   :  { %v715_v60 = vadd.f32 %v1807_v51, %v644_v57  ;;  %1460 = vmatprep.mubr.f32.mxu1 %v778_v56 }
 0x199   :  { %v431_v61 = vpop.f32.mrf.mxu0 }
 0x19a   :  { %v779_v62 = vmax.f32 %v715_v60, 0.0  ;;  %v645_v63 = vmul.f32 %v1802_v49, %v431_v61 }
 0x19b   :  { %v433_v0 = vpop.f32.mrf.mxu0 }
 0x19c   :  { %v716_v2 = vadd.f32 %v1807_v51, %v645_v63  ;;  %1461 = vmatmul.mubr.f32.gmra.mxu1 %v779_v62 }
 0x19d   :  { %v436_v4 = vpop.f32.mrf.mxu0 }
 0x19e   :  { %v780_v5 = vmax.f32 %v716_v2, 0.0  ;;  %v646_v6 = vmul.f32 %v1802_v49, %v436_v4 }
 0x19f   :  { %v438_v7 = vpop.f32.mrf.mxu0 }
 0x1a0   :  { %v717_v9 = vadd.f32 %v1807_v51, %v646_v6  ;;  %1463 = vmatprep.mubr.f32.mxu1 %v780_v5 }
 0x1a1   :  { %v441_v10 = vpop.f32.mrf.mxu0 }
 0x1a2   :  { %v781_v12 = vmax.f32 %v717_v9, 0.0  ;;  %v647_v13 = vmul.f32 %v1802_v49, %v441_v10 }
 0x1a3   :  { %v443_v14 = vpop.f32.mrf.mxu0 }
 0x1a4   :  { %v718_v16 = vadd.f32 %v1807_v51, %v647_v13  ;;  %1464 = vmatmul.mubr.f32.gmra.mxu1 %v781_v12 }
 0x1a5   :  { %v446_v17 = vpop.f32.mrf.mxu0 }
 0x1a6   :  { %v782_v18 = vmax.f32 %v718_v16, 0.0  ;;  %v648_v20 = vmul.f32 %v1802_v49, %v446_v17 }
 0x1a7   :  { %v448_v21 = vpop.f32.mrf.mxu0 }
 0x1a8   :  { %v719_v23 = vadd.f32 %v1807_v51, %v648_v20  ;;  %1466 = vmatprep.mubr.f32.mxu1 %v782_v18 }
 0x1a9   :  { %v451_v24 = vpop.f32.mrf.mxu0 }
 0x1aa   :  { %v783_v25 = vmax.f32 %v719_v23, 0.0  ;;  %v649_v26 = vmul.f32 %v1802_v49, %v451_v24 }
 0x1ab   :  { %v453_v28 = vpop.f32.mrf.mxu0 }
 0x1ac   :  { %v720_v30 = vadd.f32 %v1807_v51, %v649_v26  ;;  %1467 = vmatmul.mubr.f32.gmra.mxu1 %v783_v25 }
 0x1ad   :  { %v456_v31 = vpop.f32.mrf.mxu0 }
 0x1ae   :  { %v784_v32 = vmax.f32 %v720_v30, 0.0  ;;  %v650_v33 = vmul.f32 %v1802_v49, %v456_v31 }
 0x1af   :  { %v458_v34 = vpop.f32.mrf.mxu0 }
 0x1b0   :  { %v721_v37 = vadd.f32 %v1807_v51, %v650_v33  ;;  %1469 = vmatprep.mubr.f32.mxu1 %v784_v32 }
 0x1b1   :  { %v461_v38 = vpop.f32.mrf.mxu0 }
 0x1b2   :  { %v785_v39 = vmax.f32 %v721_v37, 0.0  ;;  %v651_v40 = vmul.f32 %v1802_v49, %v461_v38 }
 0x1b3   :  { %v463_v41 = vpop.f32.mrf.mxu0 }
 0x1b4   :  { %v722_v42 = vadd.f32 %v1807_v51, %v651_v40  ;;  %1470 = vmatmul.mubr.f32.gmra.mxu1 %v785_v39 }
 0x1b5   :  { %v466_v45 = vpop.f32.mrf.mxu0 }
 0x1b6   :  { %v786_v46 = vmax.f32 %v722_v42, 0.0  ;;  %v652_v47 = vmul.f32 %v1802_v49, %v466_v45 }
 0x1b7   :  { %v468_v48 = vpop.f32.mrf.mxu0 }
 0x1b8   :  { %v723_v50 = vadd.f32 %v1807_v51, %v652_v47  ;;  %1472 = vmatprep.mubr.f32.mxu1 %v786_v46 }
 0x1b9   :  { %v471_v53 = vpop.f32.mrf.mxu0 }
 0x1ba   :  { %v787_v55 = vmax.f32 %v723_v50, 0.0  ;;  %v653_v56 = vmul.f32 %v1802_v49, %v471_v53 }
 0x1bb   :  { %v473_v57 = vpop.f32.mrf.mxu0 }
 0x1bc   :  { %v724_v58 = vadd.f32 %v1807_v51, %v653_v56  ;;  %1473 = vmatmul.mubr.f32.gmra.mxu1 %v787_v55 }
 0x1bd   :  { %v476_v60 = vpop.f32.mrf.mxu0 }
 0x1be   :  { %v788_v61 = vmax.f32 %v724_v58, 0.0  ;;  %v654_v62 = vmul.f32 %v1802_v49, %v476_v60 }
 0x1bf   :  { %v478_v63 = vpop.f32.mrf.mxu0 }
 0x1c0   :  { %v725_v0 = vadd.f32 %v1807_v51, %v654_v62  ;;  %1475 = vmatprep.mubr.f32.mxu1 %v788_v61  ;;  %v665_v62 = vmul.f32 %v1802_v49, %v1815_v1 }
 0x1c1   :  { %v481_v2 = vpop.f32.mrf.mxu0 }
 0x1c2   :  { %v789_v4 = vmax.f32 %v725_v0, 0.0  ;;  %v655_v5 = vmul.f32 %v1802_v49, %v481_v2 }
 0x1c3   :  { %v483_v6 = vpop.f32.mrf.mxu0 }
 0x1c4   :  { %v726_v7 = vadd.f32 %v1807_v51, %v655_v5  ;;  %1476 = vmatmul.mubr.f32.gmra.mxu1 %v789_v4  ;;  %v666_v4 = vmul.f32 %v1802_v49, %v1819_v8 }
 0x1c5   :  { %v486_v9 = vpop.f32.mrf.mxu0 }
 0x1c6   :  { %v790_v10 = vmax.f32 %v726_v7, 0.0  ;;  %v656_v12 = vmul.f32 %v1802_v49, %v486_v9  ;;  %v736_v7 = vadd.f32 %v1807_v51, %v665_v62  ;;  %v667_v9 = vmul.f32 %v1802_v49, %v1823_v15 }
 0x1c7   :  { %v488_v13 = vpop.f32.mrf.mxu0  ;;  %v737_v1 = vadd.f32 %v1807_v51, %v666_v4 }
 0x1c8   :  { %v727_v14 = vadd.f32 %v1807_v51, %v656_v12  ;;  %1478 = vmatprep.mubr.f32.mxu1 %v790_v10  ;;  %v668_v13 = vmul.f32 %v1802_v49, %v1827_v22  ;;  %v738_v8 = vadd.f32 %v1807_v51, %v667_v9  ;;  %v671_v22 = vmul.f32 %v1802_v49, %v1839_v43 }
 0x1c9   :  { %v491_v16 = vpop.f32.mrf.mxu0 }
 0x1ca   :  { %v791_v17 = vmax.f32 %v727_v14, 0.0  ;;  %v657_v18 = vmul.f32 %v1802_v49, %v491_v16  ;;  %v800_v16 = vmax.f32 %v736_v7, 0.0  ;;  %v739_v15 = vadd.f32 %v1807_v51, %v668_v13 }
 0x1cb   :  { %v493_v20 = vpop.f32.mrf.mxu0 }
 0x1cc   :  { %v728_v21 = vadd.f32 %v1807_v51, %v657_v18  ;;  %1479 = vmatmul.mubr.f32.gmra.mxu1 %v791_v17  ;;  %v669_v17 = vmul.f32 %v1802_v49, %v1831_v29  ;;  %v801_v18 = vmax.f32 %v737_v1, 0.0  ;;  %v670_v20 = vmul.f32 %v1802_v49, %v1835_v36 }
 0x1cd   :  { %v496_v23 = vpop.f32.mrf.mxu0  ;;  %v672_v29 = vmul.f32 %v1802_v49, %v1843_v52  ;;  %v674_v52 = vmul.f32 %v1802_v49, %v1851_v3 }
 0x1ce   :  { %v792_v24 = vmax.f32 %v728_v21, 0.0  ;;  %v658_v25 = vmul.f32 %v1802_v49, %v496_v23  ;;  %v802_v21 = vmax.f32 %v738_v8, 0.0  ;;  %v740_v23 = vadd.f32 %v1807_v51, %v669_v17 }
 0x1cf   :  { %v498_v26 = vpop.f32.mrf.mxu0 }
 0x1d0   :  { %v729_v28 = vadd.f32 %v1807_v51, %v658_v25  ;;  %1481 = vmatprep.mubr.f32.mxu1 %v792_v24  ;;  %v803_v24 = vmax.f32 %v739_v15, 0.0  ;;  %v741_v25 = vadd.f32 %v1807_v51, %v670_v20  ;;  %v1962_v26 = vld [vmem:[%s2065_s5] ss:$0 sm:$0xff]  ;;  %v804_v36 = vmax.f32 %v740_v23, 0.0  ;;  %s1684_s5 = smov [#allocation8]  }
 0x1d1   :  { %v501_v30 = vpop.f32.mrf.mxu0  ;;  %s1293_s17 = sshll.u32 %s1684_s5, 4  ;;  %s1294_s17 = int_to_ptr.vmem [resolvable:$true] %s1293_s17 }
 0x1d2   :  { %v793_v31 = vmax.f32 %v729_v28, 0.0  ;;  %v659_v32 = vmul.f32 %v1802_v49, %v501_v30  ;;  %v742_v28 = vadd.f32 %v1807_v51, %v671_v22  ;;  %v673_v30 = vmul.f32 %v1802_v49, %v1847_v59  ;;  %s1650_s18 = scalar_lea.vmem %s1294_s17, 8192  ;;  %p1655_p2 = scmp.lt.s32.totalorder %s1294_s17, %s1294_s17 }
 0x1d3   :  { %v503_v33 = vpop.f32.mrf.mxu0  ;;  %p1651_p1 = scmp.ne.s32.totalorder %s1294_s17, %s1650_s18  ;;  %p1656_p3 = scmp.lt.s32.totalorder %s1650_s18, %s1650_s18 }
 0x1d4   :  { %v730_v34 = vadd.f32 %v1807_v51, %v659_v32  ;;  %1482 = vmatmul.mubr.f32.gmra.mxu1 %v793_v31  ;;  %v805_v32 = vmax.f32 %v741_v25, 0.0  ;;  %v743_v33 = vadd.f32 %v1807_v51, %v672_v29 }
 0x1d5   :  { %v506_v37 = vpop.f32.mrf.mxu0  ;;  %p1657_p4 = por %p1656_p3, %p1655_p2 }
 0x1d6   :  { %v794_v38 = vmax.f32 %v730_v34, 0.0  ;;  %v660_v39 = vmul.f32 %v1802_v49, %v506_v37  ;;  %v806_v37 = vmax.f32 %v742_v28, 0.0 }
 0x1d7   :  { %v508_v40 = vpop.f32.mrf.mxu0  ;;  %p1658_p5 = pnand %p1657_p4, %p1651_p1 }
 0x1d8   :  { %v731_v41 = vadd.f32 %v1807_v51, %v660_v39  ;;  %1484 = vmatprep.mubr.f32.mxu1 %v794_v38  ;;  %v744_v38 = vadd.f32 %v1807_v51, %v673_v30  ;;  %v675_v39 = vmul.f32 %v1802_v49, %v1855_v11  ;;  %v807_v40 = vmax.f32 %v743_v33, 0.0 }
 0x1d9   :  { %v511_v42 = vpop.f32.mrf.mxu0  ;;  %v679_v11 = vmul.f32 %v1802_v49, %v1871_v44 }
 0x1da   :  { %v795_v45 = vmax.f32 %v731_v41, 0.0  ;;  %v661_v46 = vmul.f32 %v1802_v49, %v511_v42  ;;  %v745_v41 = vadd.f32 %v1807_v51, %v674_v52  ;;  %v676_v42 = vmul.f32 %v1802_v49, %v1859_v19 }
 0x1db   :  { %v513_v47 = vpop.f32.mrf.mxu0  ;;  %v808_v3 = vmax.f32 %v744_v38, 0.0  ;;  %v678_v19 = vmul.f32 %v1802_v49, %v1867_v35  ;;  %v750_v44 = vadd.f32 %v1807_v51, %v679_v11 }
 0x1dc   :  { %v732_v48 = vadd.f32 %v1807_v51, %v661_v46  ;;  %1485 = vmatmul.mubr.f32.gmra.mxu1 %v795_v45  ;;  %v746_v45 = vadd.f32 %v1807_v51, %v675_v39  ;;  %v677_v46 = vmul.f32 %v1802_v49, %v1863_v27 }
 0x1dd   :  { %v516_v50 = vpop.f32.mrf.mxu0 }
 0x1de   :  { %v796_v53 = vmax.f32 %v732_v48, 0.0  ;;  %v662_v55 = vmul.f32 %v1802_v49, %v516_v50  ;;  %v809_v50 = vmax.f32 %v745_v41, 0.0 }
 0x1df   :  { %v518_v56 = vpop.f32.mrf.mxu0 }
 0x1e0   :  { %v733_v57 = vadd.f32 %v1807_v51, %v662_v55  ;;  %1487 = vmatprep.mubr.f32.mxu1 %v796_v53  ;;  %v747_v53 = vadd.f32 %v1807_v51, %v676_v42  ;;  %v810_v56 = vmax.f32 %v746_v45, 0.0 }
 0x1e1   :  { %v521_v58 = vpop.f32.mrf.mxu0 }
 0x1e2   :  { %v797_v60 = vmax.f32 %v733_v57, 0.0  ;;  %v663_v61 = vmul.f32 %v1802_v49, %v521_v58  ;;  %v748_v57 = vadd.f32 %v1807_v51, %v677_v46  ;;  %v680_v58 = vmul.f32 %v1802_v49, %v1875_v54 }
 0x1e3   :  { %v523_v63 = vpop.f32.mrf.mxu0 }
 0x1e4   :  { %v734_v0 = vadd.f32 %v1807_v51, %v663_v61  ;;  %1488 = vmatmul.mubr.f32.gmra.mxu1 %v797_v60  ;;  %v811_v60 = vmax.f32 %v747_v53, 0.0  ;;  %v749_v61 = vadd.f32 %v1807_v51, %v678_v19  ;;  %v812_v62 = vmax.f32 %v748_v57, 0.0 }
 0x1e5   :  { %v526_v2 = vpop.f32.mrf.mxu0  ;;  %v751_v35 = vadd.f32 %v1807_v51, %v680_v58 }
 0x1e6   :  { %v798_v5 = vmax.f32 %v734_v0, 0.0  ;;  %v664_v6 = vmul.f32 %v1802_v49, %v526_v2  ;;  %v814_v0 = vmax.f32 %v750_v44, 0.0  ;;  %v813_v4 = vmax.f32 %v749_v61, 0.0 }
 0x1e7   :  { %v528_v10 = vpop.f32.mrf.mxu0  ;;  %v815_v54 = vmax.f32 %v751_v35, 0.0 }
 0x1e8   :  { %v735_v12 = vadd.f32 %v1807_v51, %v664_v6  ;;  %1490 = vmatprep.mubr.f32.mxu1 %v798_v5 }
 0x1ea   :  { %v799_v14 = vmax.f32 %v735_v12, 0.0 }
 0x1ec   :  { %1491 = vmatmul.mubr.f32.gmra.mxu1 %v799_v14 }
 0x1ed   :  { %1493 = vmatprep.mubr.f32.mxu1 %v800_v16 }
 0x1f0   :  { %1494 = vmatmul.mubr.f32.gmra.mxu1 %v801_v18 }
 0x1f1   :  { %1496 = vmatprep.mubr.f32.mxu1 %v802_v21 }
 0x1f4   :  { %v1423_v43 = vpop.f32.mrf.mxu1  ;;  %1497 = vmatmul.mubr.f32.gmra.mxu1 %v803_v24 }
 0x1f5   :  { %v911_v31 = vadd.f32 %v1423_v43, %v1962_v26  ;;  %1499 = vmatprep.mubr.f32.mxu1 %v804_v36 }
 0x1f6   :  { %v905_v34 = vpop.f32.mrf.mxu1 }
 0x1f7   :  { %1225 = vst [vmem:[#allocation8 + $0x8] sm:$0xff] %v911_v31  ;;  %v906_v59 = vadd.f32 %v1962_v26, %v905_v34 }
 0x1f8   :  { %1500 = vmatmul.mubr.f32.gmra.mxu1 %v805_v32 }
 0x1f9   :  { %1224 = vst [vmem:[#allocation8] sm:$0xff] %v906_v59  ;;  %1502 = vmatprep.mubr.f32.mxu1 %v806_v37 }
 0x1fc   :  { %v1426_v47 = vpop.f32.mrf.mxu1  ;;  %1503 = vmatmul.mubr.f32.gmra.mxu1 %v807_v40 }
 0x1fd   :  { %v921_v48 = vadd.f32 %v1426_v47, %v1962_v26  ;;  %1505 = vmatprep.mubr.f32.mxu1 %v808_v3 }
 0x1fe   :  { %v915_v55 = vpop.f32.mrf.mxu1 }
 0x1ff   :  { %1227 = vst [vmem:[#allocation8 + $0x18] sm:$0xff] %v921_v48  ;;  %v916_v27 = vadd.f32 %v1962_v26, %v915_v55 }
 0x200   :  { %1506 = vmatmul.mubr.f32.gmra.mxu1 %v809_v50 }
 0x201   :  { %1226 = vst [vmem:[#allocation8 + $0x10] sm:$0xff] %v916_v27  ;;  %1508 = vmatprep.mubr.f32.mxu1 %v810_v56 }
 0x204   :  { %v1429_v63 = vpop.f32.mrf.mxu1  ;;  %1509 = vmatmul.mubr.f32.gmra.mxu1 %v811_v60 }
 0x205   :  { %v931_v2 = vadd.f32 %v1429_v63, %v1962_v26  ;;  %1511 = vmatprep.mubr.f32.mxu1 %v812_v62 }
 0x206   :  { %v925_v5 = vpop.f32.mrf.mxu1 }
 0x207   :  { %1229 = vst [vmem:[#allocation8 + $0x28] sm:$0xff] %v931_v2  ;;  %v926_v49 = vadd.f32 %v1962_v26, %v925_v5 }
 0x208   :  { %1512 = vmatmul.mubr.f32.gmra.mxu1 %v813_v4 }
 0x209   :  { %1228 = vst [vmem:[#allocation8 + $0x20] sm:$0xff] %v926_v49  ;;  %1514 = vmatprep.mubr.f32.mxu1 %v814_v0 }
 0x20c   :  { %v1432_v6 = vpop.f32.mrf.mxu1  ;;  %1515 = vmatmul.mubr.f32.gmra.mxu1 %v815_v54 }
 0x20d   :  { %v941_v7 = vadd.f32 %v1432_v6, %v1962_v26 }
 0x20e   :  { %v935_v51 = vpop.f32.mrf.mxu1 }
 0x20f   :  { %1231 = vst [vmem:[#allocation8 + $0x38] sm:$0xff] %v941_v7  ;;  %v936_v9 = vadd.f32 %v1962_v26, %v935_v51 }
 0x211   :  { %1230 = vst [vmem:[#allocation8 + $0x30] sm:$0xff] %v936_v9 }
 0x214   :  { %v1435_v10 = vpop.f32.mrf.mxu1 }
 0x215   :  { %v951_v12 = vadd.f32 %v1435_v10, %v1962_v26 }
 0x216   :  { %v945_v1 = vpop.f32.mrf.mxu1 }
 0x217   :  { %1233 = vst [vmem:[#allocation8 + $0x48] sm:$0xff] %v951_v12  ;;  %v946_v13 = vadd.f32 %v1962_v26, %v945_v1 }
 0x219   :  { %1232 = vst [vmem:[#allocation8 + $0x40] sm:$0xff] %v946_v13 }
 0x21c   :  { %v1438_v14 = vpop.f32.mrf.mxu1 }
 0x21d   :  { %v961_v16 = vadd.f32 %v1438_v14, %v1962_v26 }
 0x21e   :  { %v955_v8 = vpop.f32.mrf.mxu1 }
 0x21f   :  { %1235 = vst [vmem:[#allocation8 + $0x58] sm:$0xff] %v961_v16  ;;  %v956_v17 = vadd.f32 %v1962_v26, %v955_v8 }
 0x221   :  { %1234 = vst [vmem:[#allocation8 + $0x50] sm:$0xff] %v956_v17 }
 0x224   :  { %v1441_v18 = vpop.f32.mrf.mxu1 }
 0x225   :  { %v971_v15 = vadd.f32 %v1441_v18, %v1962_v26 }
 0x226   :  { %v965_v20 = vpop.f32.mrf.mxu1 }
 0x227   :  { %1237 = vst [vmem:[#allocation8 + $0x68] sm:$0xff] %v971_v15  ;;  %v966_v21 = vadd.f32 %v1962_v26, %v965_v20 }
 0x229   :  { %1236 = vst [vmem:[#allocation8 + $0x60] sm:$0xff] %v966_v21 }
 0x22c   :  { %v1444_v23 = vpop.f32.mrf.mxu1 }
 0x22d   :  { %v981_v22 = vadd.f32 %v1444_v23, %v1962_v26 }
 0x22e   :  { %v975_v24 = vpop.f32.mrf.mxu1 }
 0x22f   :  { %1239 = vst [vmem:[#allocation8 + $0x78] sm:$0xff] %v981_v22  ;;  %v976_v25 = vadd.f32 %v1962_v26, %v975_v24 }
 0x231   :  { %1238 = vst [vmem:[#allocation8 + $0x70] sm:$0xff] %v976_v25 }
 0x234   :  { %v1447_v29 = vpop.f32.mrf.mxu1 }
 0x235   :  { %v991_v36 = vadd.f32 %v1447_v29, %v1962_v26 }
 0x236   :  { %v985_v28 = vpop.f32.mrf.mxu1 }
 0x237   :  { %1241 = vst [vmem:[#allocation8 + $0x88] sm:$0xff] %v991_v36  ;;  %v986_v30 = vadd.f32 %v1962_v26, %v985_v28 }
 0x239   :  { %1240 = vst [vmem:[#allocation8 + $0x80] sm:$0xff] %v986_v30 }
 0x23c   :  { %v1450_v43 = vpop.f32.mrf.mxu1 }
 0x23d   :  { %v1001_v31 = vadd.f32 %v1450_v43, %v1962_v26 }
 0x23e   :  { %v995_v32 = vpop.f32.mrf.mxu1 }
 0x23f   :  { %1243 = vst [vmem:[#allocation8 + $0x98] sm:$0xff] %v1001_v31  ;;  %v996_v33 = vadd.f32 %v1962_v26, %v995_v32 }
 0x241   :  { %1242 = vst [vmem:[#allocation8 + $0x90] sm:$0xff] %v996_v33 }
 0x244   :  { %v1453_v52 = vpop.f32.mrf.mxu1 }
 0x245   :  { %v1011_v34 = vadd.f32 %v1453_v52, %v1962_v26 }
 0x246   :  { %v1005_v37 = vpop.f32.mrf.mxu1 }
 0x247   :  { %1245 = vst [vmem:[#allocation8 + $0xa8] sm:$0xff] %v1011_v34  ;;  %v1006_v38 = vadd.f32 %v1962_v26, %v1005_v37 }
 0x249   :  { %1244 = vst [vmem:[#allocation8 + $0xa0] sm:$0xff] %v1006_v38 }
 0x24c   :  { %v1456_v39 = vpop.f32.mrf.mxu1 }
 0x24d   :  { %v1021_v59 = vadd.f32 %v1456_v39, %v1962_v26 }
 0x24e   :  { %v1015_v40 = vpop.f32.mrf.mxu1 }
 0x24f   :  { %1247 = vst [vmem:[#allocation8 + $0xb8] sm:$0xff] %v1021_v59  ;;  %v1016_v41 = vadd.f32 %v1962_v26, %v1015_v40 }
 0x251   :  { %1246 = vst [vmem:[#allocation8 + $0xb0] sm:$0xff] %v1016_v41 }
 0x254   :  { %v1459_v42 = vpop.f32.mrf.mxu1 }
 0x255   :  { %v1031_v3 = vadd.f32 %v1459_v42, %v1962_v26 }
 0x256   :  { %v1025_v45 = vpop.f32.mrf.mxu1 }
 0x257   :  { %1249 = vst [vmem:[#allocation8 + $0xc8] sm:$0xff] %v1031_v3  ;;  %v1026_v46 = vadd.f32 %v1962_v26, %v1025_v45 }
 0x259   :  { %1248 = vst [vmem:[#allocation8 + $0xc0] sm:$0xff] %v1026_v46 }
 0x25c   :  { %v1462_v47 = vpop.f32.mrf.mxu1 }
 0x25d   :  { %v1041_v11 = vadd.f32 %v1462_v47, %v1962_v26 }
 0x25e   :  { %v1035_v48 = vpop.f32.mrf.mxu1 }
 0x25f   :  { %1251 = vst [vmem:[#allocation8 + $0xd8] sm:$0xff] %v1041_v11  ;;  %v1036_v50 = vadd.f32 %v1962_v26, %v1035_v48 }
 0x261   :  { %1250 = vst [vmem:[#allocation8 + $0xd0] sm:$0xff] %v1036_v50 }
 0x264   :  { %v1465_v53 = vpop.f32.mrf.mxu1 }
 0x265   :  { %v1051_v19 = vadd.f32 %v1465_v53, %v1962_v26 }
 0x266   :  { %v1045_v55 = vpop.f32.mrf.mxu1 }
 0x267   :  { %1253 = vst [vmem:[#allocation8 + $0xe8] sm:$0xff] %v1051_v19  ;;  %v1046_v56 = vadd.f32 %v1962_v26, %v1045_v55 }
 0x269   :  { %1252 = vst [vmem:[#allocation8 + $0xe0] sm:$0xff] %v1046_v56 }
 0x26c   :  { %v1468_v57 = vpop.f32.mrf.mxu1 }
 0x26d   :  { %v1061_v27 = vadd.f32 %v1468_v57, %v1962_v26 }
 0x26e   :  { %v1055_v58 = vpop.f32.mrf.mxu1 }
 0x26f   :  { %1255 = vst [vmem:[#allocation8 + $0xf8] sm:$0xff] %v1061_v27  ;;  %v1056_v44 = vadd.f32 %v1962_v26, %v1055_v58 }
 0x271   :  { %1254 = vst [vmem:[#allocation8 + $0xf0] sm:$0xff] %v1056_v44 }
 0x274   :  { %v1471_v60 = vpop.f32.mrf.mxu1 }
 0x275   :  { %v1071_v61 = vadd.f32 %v1471_v60, %v1962_v26 }
 0x276   :  { %v1065_v62 = vpop.f32.mrf.mxu1 }
 0x277   :  { %1257 = vst [vmem:[#allocation8 + $0x108] sm:$0xff] %v1071_v61  ;;  %v1066_v35 = vadd.f32 %v1962_v26, %v1065_v62 }
 0x279   :  { %1256 = vst [vmem:[#allocation8 + $0x100] sm:$0xff] %v1066_v35 }
 0x27c   :  { %v1474_v63 = vpop.f32.mrf.mxu1 }
 0x27d   :  { %v1081_v0 = vadd.f32 %v1474_v63, %v1962_v26 }
 0x27e   :  { %v1075_v2 = vpop.f32.mrf.mxu1 }
 0x27f   :  { %1259 = vst [vmem:[#allocation8 + $0x118] sm:$0xff] %v1081_v0  ;;  %v1076_v4 = vadd.f32 %v1962_v26, %v1075_v2 }
 0x281   :  { %1258 = vst [vmem:[#allocation8 + $0x110] sm:$0xff] %v1076_v4 }
 0x284   :  { %v1477_v5 = vpop.f32.mrf.mxu1 }
 0x285   :  { %v1091_v49 = vadd.f32 %v1477_v5, %v1962_v26 }
 0x286   :  { %v1085_v54 = vpop.f32.mrf.mxu1 }
 0x287   :  { %1261 = vst [vmem:[#allocation8 + $0x128] sm:$0xff] %v1091_v49  ;;  %v1086_v6 = vadd.f32 %v1962_v26, %v1085_v54 }
 0x289   :  { %1260 = vst [vmem:[#allocation8 + $0x120] sm:$0xff] %v1086_v6 }
 0x28c   :  { %v1480_v7 = vpop.f32.mrf.mxu1 }
 0x28d   :  { %v1101_v51 = vadd.f32 %v1480_v7, %v1962_v26 }
 0x28e   :  { %v1095_v9 = vpop.f32.mrf.mxu1 }
 0x28f   :  { %1263 = vst [vmem:[#allocation8 + $0x138] sm:$0xff] %v1101_v51  ;;  %v1096_v10 = vadd.f32 %v1962_v26, %v1095_v9 }
 0x291   :  { %1262 = vst [vmem:[#allocation8 + $0x130] sm:$0xff] %v1096_v10 }
 0x294   :  { %v1483_v12 = vpop.f32.mrf.mxu1 }
 0x295   :  { %v1111_v1 = vadd.f32 %v1483_v12, %v1962_v26 }
 0x296   :  { %v1105_v13 = vpop.f32.mrf.mxu1 }
 0x297   :  { %1265 = vst [vmem:[#allocation8 + $0x148] sm:$0xff] %v1111_v1  ;;  %v1106_v14 = vadd.f32 %v1962_v26, %v1105_v13 }
 0x299   :  { %1264 = vst [vmem:[#allocation8 + $0x140] sm:$0xff] %v1106_v14 }
 0x29c   :  { %v1486_v16 = vpop.f32.mrf.mxu1 }
 0x29d   :  { %v1121_v8 = vadd.f32 %v1486_v16, %v1962_v26 }
 0x29e   :  { %v1115_v17 = vpop.f32.mrf.mxu1 }
 0x29f   :  { %1267 = vst [vmem:[#allocation8 + $0x158] sm:$0xff] %v1121_v8  ;;  %v1116_v18 = vadd.f32 %v1962_v26, %v1115_v17 }
 0x2a1   :  { %1266 = vst [vmem:[#allocation8 + $0x150] sm:$0xff] %v1116_v18 }
 0x2a4   :  { %v1489_v15 = vpop.f32.mrf.mxu1 }
 0x2a5   :  { %v1131_v20 = vadd.f32 %v1489_v15, %v1962_v26 }
 0x2a6   :  { %v1125_v21 = vpop.f32.mrf.mxu1 }
 0x2a7   :  { %1269 = vst [vmem:[#allocation8 + $0x168] sm:$0xff] %v1131_v20  ;;  %v1126_v23 = vadd.f32 %v1962_v26, %v1125_v21 }
 0x2a9   :  { %1268 = vst [vmem:[#allocation8 + $0x160] sm:$0xff] %v1126_v23 }
 0x2ac   :  { %v1492_v22 = vpop.f32.mrf.mxu1 }
 0x2ad   :  { %v1141_v24 = vadd.f32 %v1492_v22, %v1962_v26 }
 0x2ae   :  { %v1135_v25 = vpop.f32.mrf.mxu1 }
 0x2af   :  { %1271 = vst [vmem:[#allocation8 + $0x178] sm:$0xff] %v1141_v24  ;;  %v1136_v29 = vadd.f32 %v1962_v26, %v1135_v25 }
 0x2b0   :  { %v1495_v36 = vpop.f32.mrf.mxu1 }
 0x2b1   :  { %1270 = vst [vmem:[#allocation8 + $0x170] sm:$0xff] %v1136_v29  ;;  %v1151_v28 = vadd.f32 %v1495_v36, %v1962_v26 }
 0x2b2   :  { %v1145_v30 = vpop.f32.mrf.mxu1 }
 0x2b3   :  { %1273 = vst [vmem:[#allocation8 + $0x188] sm:$0xff] %v1151_v28  ;;  %v1146_v43 = vadd.f32 %v1962_v26, %v1145_v30 }
 0x2b4   :  { %v1498_v31 = vpop.f32.mrf.mxu1 }
 0x2b5   :  { %1272 = vst [vmem:[#allocation8 + $0x180] sm:$0xff] %v1146_v43  ;;  %v1161_v32 = vadd.f32 %v1498_v31, %v1962_v26 }
 0x2b6   :  { %v1155_v33 = vpop.f32.mrf.mxu1 }
 0x2b7   :  { %1275 = vst [vmem:[#allocation8 + $0x198] sm:$0xff] %v1161_v32  ;;  %v1156_v52 = vadd.f32 %v1962_v26, %v1155_v33 }
 0x2b8   :  { %v1501_v34 = vpop.f32.mrf.mxu1 }
 0x2b9   :  { %1274 = vst [vmem:[#allocation8 + $0x190] sm:$0xff] %v1156_v52  ;;  %v1171_v37 = vadd.f32 %v1501_v34, %v1962_v26 }
 0x2ba   :  { %v1165_v38 = vpop.f32.mrf.mxu1 }
 0x2bb   :  { %1277 = vst [vmem:[#allocation8 + $0x1a8] sm:$0xff] %v1171_v37  ;;  %v1166_v39 = vadd.f32 %v1962_v26, %v1165_v38 }
 0x2bc   :  { %v1504_v59 = vpop.f32.mrf.mxu1 }
 0x2bd   :  { %1276 = vst [vmem:[#allocation8 + $0x1a0] sm:$0xff] %v1166_v39  ;;  %v1181_v40 = vadd.f32 %v1504_v59, %v1962_v26 }
 0x2be   :  { %v1175_v41 = vpop.f32.mrf.mxu1 }
 0x2bf   :  { %1279 = vst [vmem:[#allocation8 + $0x1b8] sm:$0xff] %v1181_v40  ;;  %v1176_v42 = vadd.f32 %v1962_v26, %v1175_v41 }
 0x2c0   :  { %v1507_v3 = vpop.f32.mrf.mxu1 }
 0x2c1   :  { %1278 = vst [vmem:[#allocation8 + $0x1b0] sm:$0xff] %v1176_v42  ;;  %v1191_v45 = vadd.f32 %v1507_v3, %v1962_v26 }
 0x2c2   :  { %v1185_v46 = vpop.f32.mrf.mxu1 }
 0x2c3   :  { %1281 = vst [vmem:[#allocation8 + $0x1c8] sm:$0xff] %v1191_v45  ;;  %v1186_v47 = vadd.f32 %v1962_v26, %v1185_v46 }
 0x2c4   :  { %v1510_v11 = vpop.f32.mrf.mxu1 }
 0x2c5   :  { %1280 = vst [vmem:[#allocation8 + $0x1c0] sm:$0xff] %v1186_v47  ;;  %v1201_v48 = vadd.f32 %v1510_v11, %v1962_v26 }
 0x2c6   :  { %v1195_v50 = vpop.f32.mrf.mxu1 }
 0x2c7   :  { %1283 = vst [vmem:[#allocation8 + $0x1d8] sm:$0xff] %v1201_v48  ;;  %v1196_v53 = vadd.f32 %v1962_v26, %v1195_v50 }
 0x2c8   :  { %v1513_v19 = vpop.f32.mrf.mxu1 }
 0x2c9   :  { %1282 = vst [vmem:[#allocation8 + $0x1d0] sm:$0xff] %v1196_v53  ;;  %v1211_v55 = vadd.f32 %v1513_v19, %v1962_v26 }
 0x2ca   :  { %v1205_v56 = vpop.f32.mrf.mxu1 }
 0x2cb   :  { %1285 = vst [vmem:[#allocation8 + $0x1e8] sm:$0xff] %v1211_v55  ;;  %v1206_v57 = vadd.f32 %v1962_v26, %v1205_v56 }
 0x2cc   :  { %v1516_v27 = vpop.f32.mrf.mxu1 }
 0x2cd   :  { %1284 = vst [vmem:[#allocation8 + $0x1e0] sm:$0xff] %v1206_v57  ;;  %v1221_v58 = vadd.f32 %v1516_v27, %v1962_v26 }
 0x2ce   :  { %v1215_v44 = vpop.f32.mrf.mxu1 }
 0x2cf   :  { %1287 = vst [vmem:[#allocation8 + $0x1f8] sm:$0xff] %v1221_v58  ;;  %v1216_v60 = vadd.f32 %v1962_v26, %v1215_v44 }
 0x2d1   :  { %1286 = vst [vmem:[#allocation8 + $0x1f0] sm:$0xff] %v1216_v60 }
 0x2d2   :  { %1661 = shalt.err (!%p1658_p5)
}
 0x2d3   :  { %1299 = dma.vmem_to_hbm [thread:$0]  %s1294_s17, 8192, %s2066_s6, [#allocation4], %s1677_s24, %s1677_s24, %s1678_s25  }
 0x2d4   :  { %1674 = dma.done.wait [#allocation4], 8192  }
 0x2d5   :  { %1675 = vsyncadd [#allocation4], 4294959104 }
 0x2d6   :  { %1303 = vsyncpa [#allocation3], 1 }
 0x2d7   :  { %1304 = vsyncpa [#allocation6], 1 }
 0x2d8   :  { %1305 = vsyncpa [#allocation4], 1 }

</bundles_post_ra>
